<compile_context>
chip_gen: v7x
topology: tpu7x:2x2x1
jax: 0.10.0
libtpu: 0.0.40
codegen_flags: <defaults>
</compile_context>

<pallas_src>
import math
import numpy as np
import jax
import jax.numpy as jnp
from jax import lax
from jax.experimental import pallas as pl
from jax.experimental.pallas import tpu as pltpu

# ----------------------------- model config ---------------------------------
LATENT_DIM = 4
HIDDEN = 128          # d_model
NHEAD = 8
HEAD_DIM = HIDDEN // NHEAD
NUM_LAYERS = 4
FFN = HIDDEN * 4
DIN = 2 * LATENT_DIM + 1   # 9
DIN_PAD = 128              # lane-padded input width
LN_EPS = 1e-5
SCALE = 1.0 / math.sqrt(HEAD_DIM)

B = 2
S = 8
BS = B * S                 # folded batch*seq rows


# ------------------------------ kernel --------------------------------------
def dit_kernel(xc_ref, pe_ref, amask_ref, bones_ref, win_ref, whead_ref, bhead_ref,
               wqkv_ref, bqkv_ref, wo_ref, bo_ref,
               ln1g_ref, ln1b_ref,
               w1_ref, b1_ref, w2_ref, b2_ref,
               ln2g_ref, ln2b_ref,
               out_ref, x_scr):
    l = pl.program_id(0)

    def mm_bf16(x, w, b):
        # bf16 x bf16 MXU matmul with f32 accumulation.
        return jnp.dot(x.astype(jnp.bfloat16), w,
                       preferred_element_type=jnp.float32) + b

    def layer_norm(x, g, b):
        # var = E[x^2] - mean^2 -> the two cross-lane reductions are independent.
        mean = jnp.mean(x, axis=-1, keepdims=True)
        meansq = jnp.mean(x * x, axis=-1, keepdims=True)
        var = meansq - mean * mean
        return (x - mean) * lax.rsqrt(var + LN_EPS) * g + b

    # ---- layer 0: input projection (+ bias & positional encoding folded) ----
    @pl.when(l == 0)
    def _():
        x_scr[...] = jnp.dot(xc_ref[...].astype(jnp.bfloat16), win_ref[...],
                             preferred_element_type=jnp.float32) + pe_ref[...]

    x = x_scr[...]                                  # (BS, HIDDEN) f32
    bones = bones_ref[...]                          # (HIDDEN, HIDDEN) head-block-diag 0/1

    # ---- packed multi-head self-attention (all heads in one lane-dense slab) ----
    qkv = mm_bf16(x, wqkv_ref[0], bqkv_ref[0])      # (BS, 3*HIDDEN) f32
    q = qkv[:, :HIDDEN] * SCALE
    k = qkv[:, HIDDEN:2 * HIDDEN]
    v = qkv[:, 2 * HIDDEN:]

    # scores for all heads: S[:, h*Dh + j] = (Q_h @ K_h^T)[:, j]
    kt_packed = jnp.concatenate([k.T] * NHEAD, axis=1) * bones          # (HIDDEN, HIDDEN)
    s = jnp.dot(q, kt_packed, preferred_element_type=jnp.float32) + amask_ref[...]
    # single full-128-lane row max; shift-invariant per head.
    s = s - jnp.max(s, axis=-1, keepdims=True)
    p = jnp.exp(s)
    # per-head denominators, lane-broadcast within each head block.
    denom = jnp.dot(p, bones, preferred_element_type=jnp.float32)
    p = p * pl.reciprocal(denom, approx=True)
    # O[:, h*Dh:(h+1)*Dh] = P_h @ V_h -> heads already lane-concatenated.
    v_packed = jnp.concatenate([v] * NHEAD, axis=0) * bones             # (HIDDEN, HIDDEN)
    attn = jnp.dot(p, v_packed, preferred_element_type=jnp.float32)     # (BS, HIDDEN)

    attn = mm_bf16(attn, wo_ref[0], bo_ref[0])
    x = layer_norm(x + attn, ln1g_ref[0], ln1b_ref[0])

    # ---- feed-forward (relu) ----
    h1 = jnp.maximum(mm_bf16(x, w1_ref[0], b1_ref[0]), 0.0)
    ff = mm_bf16(h1, w2_ref[0], b2_ref[0])
    x = layer_norm(x + ff, ln2g_ref[0], ln2b_ref[0])
    x_scr[...] = x

    # ---- fused mu/logvar head on the full slab (lane/sublane-dense store) ----
    @pl.when(l == NUM_LAYERS - 1)
    def _():
        out_ref[...] = jnp.dot(x.astype(jnp.bfloat16), whead_ref[...],
                               preferred_element_type=jnp.float32) + bhead_ref[...]


# ------------------------------ wrapper --------------------------------------
def _const_spec(a):
    nd = a.ndim
    return pl.BlockSpec(a.shape, lambda l, _nd=nd: (0,) * _nd)


def _layer_spec(a):
    nd = a.ndim
    return pl.BlockSpec((1,) + a.shape[1:], lambda l, _nd=nd: (l,) + (0,) * (_nd - 1))


def dit_forward(params, input_mu, input_logvar, action):
    x_cat = jnp.concatenate([input_mu, input_logvar, action], axis=-1)   # (B, S, 9)
    x_cat = x_cat.reshape(BS, DIN)
    x_cat = jnp.pad(x_cat, ((0, 0), (0, DIN_PAD - DIN)))                 # (16, 128)

    p = params
    const_inputs = (x_cat, p["pe_fold"], p["amask_tiled"], p["bones"],
                    p["win_bf16"], p["whead_bf16"], p["bhead"])
    layer_inputs = (p["wqkv_bf16"], p["bqkv"], p["wo_bf16"], p["bo"],
                    p["ln1g"], p["ln1b"],
                    p["w1_bf16"], p["b1"], p["w2_bf16"], p["b2"],
                    p["ln2g"], p["ln2b"])

    grid_spec = pltpu.PrefetchScalarGridSpec(
        num_scalar_prefetch=0,
        grid=(NUM_LAYERS,),
        in_specs=[_const_spec(a) for a in const_inputs]
                 + [_layer_spec(a) for a in layer_inputs],
        out_specs=pl.BlockSpec((BS, HIDDEN), lambda l: (0, 0)),
        scratch_shapes=[pltpu.VMEM((BS, HIDDEN), jnp.float32)],
    )

    out = pl.pallas_call(
        dit_kernel,
        out_shape=jax.ShapeDtypeStruct((BS, HIDDEN), jnp.float32),
        grid_spec=grid_spec,
        compiler_params=pltpu.CompilerParams(dimension_semantics=("arbitrary",)),
    )(*const_inputs, *layer_inputs)

    x_last = out[S - 1::S, :]                                            # rows 7, 15 -> (B, HIDDEN)
    mu = x_last[:, 0:LATENT_DIM].reshape(B, 1, LATENT_DIM)
    logvar = x_last[:, LATENT_DIM:2 * LATENT_DIM].reshape(B, 1, LATENT_DIM)
    return mu, logvar


# -------------------------- parameter construction ---------------------------
def _xavier(key, shape):
    fan_in, fan_out = shape[-2], shape[-1]
    lim = math.sqrt(6.0 / (fan_in + fan_out))
    return jax.random.uniform(key, shape, jnp.float32, -lim, lim)


def _positional_encoding(dim, max_len=5000):
    pe = np.zeros((max_len, dim), dtype=np.float32)
    position = np.arange(0, max_len, dtype=np.float32)[:, None]
    div_term = np.exp(np.arange(0, dim, 2, dtype=np.float32) * (-math.log(10000.0) / dim))
    pe[:, 0::2] = np.sin(position * div_term)
    pe[:, 1::2] = np.cos(position * div_term)
    return jnp.asarray(pe)


def make_params(key):
    keys = jax.random.split(key, 16)
    win = _xavier(keys[0], (DIN, HIDDEN))                       # input_proj (right-mul)
    bin_ = jnp.zeros((1, HIDDEN), jnp.float32)
    wqkv = _xavier(keys[1], (NUM_LAYERS, HIDDEN, 3 * HIDDEN))
    bqkv = 0.01 * jax.random.normal(keys[2], (NUM_LAYERS, 1, 3 * HIDDEN), jnp.float32)
    wo = _xavier(keys[3], (NUM_LAYERS, HIDDEN, HIDDEN))
    bo = 0.01 * jax.random.normal(keys[4], (NUM_LAYERS, 1, HIDDEN), jnp.float32)
    w1 = _xavier(keys[5], (NUM_LAYERS, HIDDEN, FFN))
    b1 = 0.01 * jax.random.normal(keys[6], (NUM_LAYERS, 1, FFN), jnp.float32)
    w2 = _xavier(keys[7], (NUM_LAYERS, FFN, HIDDEN))
    b2 = 0.01 * jax.random.normal(keys[8], (NUM_LAYERS, 1, HIDDEN), jnp.float32)
    ln1g = jnp.ones((NUM_LAYERS, 1, HIDDEN), jnp.float32)
    ln1b = jnp.zeros((NUM_LAYERS, 1, HIDDEN), jnp.float32)
    ln2g = jnp.ones((NUM_LAYERS, 1, HIDDEN), jnp.float32)
    ln2b = jnp.zeros((NUM_LAYERS, 1, HIDDEN), jnp.float32)
    wmu = _xavier(keys[9], (HIDDEN, LATENT_DIM))
    wlv = _xavier(keys[10], (HIDDEN, LATENT_DIM))
    bmu = jnp.zeros((1, LATENT_DIM), jnp.float32)
    blv = jnp.zeros((1, LATENT_DIM), jnp.float32)

    pe = _positional_encoding(HIDDEN)[:S, :]                    # (S, HIDDEN)

    # ---- kernel-packed versions ----
    # input-proj bias folded into PE, tiled over the folded batch: (B*S, HIDDEN)
    pe_fold = jnp.tile(pe + bin_, (B, 1))
    # lane-tiled additive batch mask: (BS, NHEAD*BS) = (16, 128)
    same_batch = (np.arange(BS)[:, None] // S) == (np.arange(BS)[None, :] // S)
    amask16 = np.where(same_batch, 0.0, -1e30).astype(np.float32)        # (16, 16)
    amask_tiled = jnp.asarray(np.tile(amask16, (1, NHEAD)))              # (16, 128)
    # head-block-diagonal 0/1 matrix, reused for K^T masking, denominators, V masking
    head_blk = (np.arange(HIDDEN)[:, None] // HEAD_DIM) == (np.arange(HIDDEN)[None, :] // HEAD_DIM)
    bones = jnp.asarray(head_blk.astype(np.float32))                     # (128, 128)
    # lane-padded input projection weight (9 -> 128 rows), bf16
    win_pad = jnp.pad(win, ((0, DIN_PAD - DIN), (0, 0)))
    # fused mu/logvar head: columns [0:4] = wmu, [4:8] = wlv, rest zero
    whead = jnp.zeros((HIDDEN, HIDDEN), jnp.float32)
    whead = whead.at[:, 0:LATENT_DIM].set(wmu).at[:, LATENT_DIM:2 * LATENT_DIM].set(wlv)
    bhead = jnp.zeros((1, HIDDEN), jnp.float32)
    bhead = bhead.at[:, 0:LATENT_DIM].set(bmu).at[:, LATENT_DIM:2 * LATENT_DIM].set(blv)

    params = dict(
        # reference (f32, unpadded)
        pe=pe, win=win, bin=bin_,
        wqkv=wqkv, bqkv=bqkv, wo=wo, bo=bo,
        ln1g=ln1g, ln1b=ln1b, w1=w1, b1=b1, w2=w2, b2=b2,
        ln2g=ln2g, ln2b=ln2b,
        wmu=wmu, bmu=bmu, wlv=wlv, blv=blv,
        # kernel-packed
        pe_fold=pe_fold, amask_tiled=amask_tiled, bones=bones,
        win_bf16=win_pad.astype(jnp.bfloat16),
        wqkv_bf16=wqkv.astype(jnp.bfloat16),
        wo_bf16=wo.astype(jnp.bfloat16),
        w1_bf16=w1.astype(jnp.bfloat16),
        w2_bf16=w2.astype(jnp.bfloat16),
        whead_bf16=whead.astype(jnp.bfloat16), bhead=bhead,
    )
    return params


# ------------------------- pure-JAX reference ---------------------------------
def reference_forward(p, input_mu, input_logvar, action):
    x = jnp.concatenate([input_mu, input_logvar, action], axis=-1)
    x = x @ p["win"] + p["bin"]
    x = x + p["pe"][None, :, :]

    def ln(x, g, b):
        m = jnp.mean(x, axis=-1, keepdims=True)
        v = jnp.mean((x - m) ** 2, axis=-1, keepdims=True)
        return (x - m) / jnp.sqrt(v + LN_EPS) * g + b

    for l in range(NUM_LAYERS):
        qkv = x @ p["wqkv"][l] + p["bqkv"][l]
        q, k, v = jnp.split(qkv, 3, axis=-1)

        def heads(t):
            return t.reshape(B, S, NHEAD, HEAD_DIM).transpose(0, 2, 1, 3)

        qh, kh, vh = heads(q), heads(k), heads(v)
        s = jnp.einsum("bhqd,bhkd->bhqk", qh, kh) * SCALE
        a = jax.nn.softmax(s, axis=-1)
        o = jnp.einsum("bhqk,bhkd->bhqd", a, vh).transpose(0, 2, 1, 3).reshape(B, S, HIDDEN)
        o = o @ p["wo"][l] + p["bo"][l]
        x = ln(x + o, p["ln1g"][l], p["ln1b"][l])
        h = jax.nn.relu(x @ p["w1"][l] + p["b1"][l])
        f = h @ p["w2"][l] + p["b2"][l]
        x = ln(x + f, p["ln2g"][l], p["ln2b"][l])

    xl = x[:, -1:, :]
    return xl @ p["wmu"] + p["bmu"], xl @ p["wlv"] + p["blv"]


# --------------------------------- main ---------------------------------------
if __name__ == "__main__":
    key = jax.random.PRNGKey(0)
    kp, k1, k2, k3 = jax.random.split(key, 4)
    params = make_params(kp)

    input_mu = jax.random.normal(k1, (B, S, LATENT_DIM), jnp.float32)
    input_logvar = jax.random.normal(k2, (B, S, LATENT_DIM), jnp.float32)
    action = jax.random.normal(k3, (B, S, 1), jnp.float32)

    mu, logvar = dit_forward(params, input_mu, input_logvar, action)
    jax.block_until_ready((mu, logvar))

    mu_ref, lv_ref = reference_forward(params, input_mu, input_logvar, action)
    assert mu.shape == (B, 1, LATENT_DIM) and logvar.shape == (B, 1, LATENT_DIM)
    # bf16 weights / bf16 matmul inputs introduce ~1e-2 drift vs the all-f32 reference
    np.testing.assert_allclose(np.asarray(mu), np.asarray(mu_ref), rtol=5e-2, atol=5e-2)
    np.testing.assert_allclose(np.asarray(logvar), np.asarray(lv_ref), rtol=5e-2, atol=5e-2)

    print("KERNEL_OK")
</pallas_src>

<mosaic_0001>
module attributes {stable_mosaic.version = 11 : i64} {
  func.func @dit_kernel(%arg0: i32, %arg1: memref<16x128xf32, #tpu.memory_space<vmem>>, %arg2: memref<16x128xf32, #tpu.memory_space<vmem>>, %arg3: memref<16x128xf32, #tpu.memory_space<vmem>>, %arg4: memref<128x128xf32, #tpu.memory_space<vmem>>, %arg5: memref<128x128xbf16, #tpu.memory_space<vmem>>, %arg6: memref<128x128xbf16, #tpu.memory_space<vmem>>, %arg7: memref<1x128xf32, #tpu.memory_space<vmem>>, %arg8: memref<1x128x384xbf16, #tpu.memory_space<vmem>>, %arg9: memref<1x1x384xf32, #tpu.memory_space<vmem>>, %arg10: memref<1x128x128xbf16, #tpu.memory_space<vmem>>, %arg11: memref<1x1x128xf32, #tpu.memory_space<vmem>>, %arg12: memref<1x1x128xf32, #tpu.memory_space<vmem>>, %arg13: memref<1x1x128xf32, #tpu.memory_space<vmem>>, %arg14: memref<1x128x512xbf16, #tpu.memory_space<vmem>>, %arg15: memref<1x1x512xf32, #tpu.memory_space<vmem>>, %arg16: memref<1x512x128xbf16, #tpu.memory_space<vmem>>, %arg17: memref<1x1x128xf32, #tpu.memory_space<vmem>>, %arg18: memref<1x1x128xf32, #tpu.memory_space<vmem>>, %arg19: memref<1x1x128xf32, #tpu.memory_space<vmem>>, %arg20: memref<16x128xf32, #tpu.memory_space<vmem>>, %arg21: memref<16x128xf32, #tpu.memory_space<vmem>>) attributes {dimension_semantics = [#tpu.dimension_semantics<arbitrary>], iteration_bounds = array<i64: 4>, scalar_prefetch = 0 : i64, scratch_operands = 1 : i64, tpu.core_type = #tpu.core_type<tc>, window_params = [{pipeline_mode = #tpu.pipeline_mode<synchronous>, transform_indices = @transform_0, window_bounds = array<i64: 16, 128>}, {pipeline_mode = #tpu.pipeline_mode<synchronous>, transform_indices = @transform_1, window_bounds = array<i64: 16, 128>}, {pipeline_mode = #tpu.pipeline_mode<synchronous>, transform_indices = @transform_2, window_bounds = array<i64: 16, 128>}, {pipeline_mode = #tpu.pipeline_mode<synchronous>, transform_indices = @transform_3, window_bounds = array<i64: 128, 128>}, {pipeline_mode = #tpu.pipeline_mode<synchronous>, transform_indices = @transform_4, window_bounds = array<i64: 128, 128>}, {pipeline_mode = #tpu.pipeline_mode<synchronous>, transform_indices = @transform_5, window_bounds = array<i64: 128, 128>}, {pipeline_mode = #tpu.pipeline_mode<synchronous>, transform_indices = @transform_6, window_bounds = array<i64: 1, 128>}, {transform_indices = @transform_7, window_bounds = array<i64: 1, 128, 384>}, {transform_indices = @transform_8, window_bounds = array<i64: 1, 1, 384>}, {transform_indices = @transform_9, window_bounds = array<i64: 1, 128, 128>}, {transform_indices = @transform_10, window_bounds = array<i64: 1, 1, 128>}, {transform_indices = @transform_11, window_bounds = array<i64: 1, 1, 128>}, {transform_indices = @transform_12, window_bounds = array<i64: 1, 1, 128>}, {transform_indices = @transform_13, window_bounds = array<i64: 1, 128, 512>}, {transform_indices = @transform_14, window_bounds = array<i64: 1, 1, 512>}, {transform_indices = @transform_15, window_bounds = array<i64: 1, 512, 128>}, {transform_indices = @transform_16, window_bounds = array<i64: 1, 1, 128>}, {transform_indices = @transform_17, window_bounds = array<i64: 1, 1, 128>}, {transform_indices = @transform_18, window_bounds = array<i64: 1, 1, 128>}, {pipeline_mode = #tpu.pipeline_mode<synchronous>, transform_indices = @transform_19, window_bounds = array<i64: 16, 128>}]} {
    %c0_i32 = arith.constant 0 : i32
    %0 = arith.cmpi eq, %arg0, %c0_i32 : i32
    %1 = arith.extui %0 : i1 to i32
    %c0_i32_0 = arith.constant 0 : i32
    %2 = arith.cmpi ne, %1, %c0_i32_0 : i32
    scf.if %2 {
      %c0_64 = arith.constant 0 : index
      %c0_65 = arith.constant 0 : index
      %119 = vector.load %arg1[%c0_64, %c0_65] : memref<16x128xf32, #tpu.memory_space<vmem>>, vector<16x128xf32>
      %120 = arith.truncf %119 : vector<16x128xf32> to vector<16x128xbf16>
      %c0_66 = arith.constant 0 : index
      %c0_67 = arith.constant 0 : index
      %121 = vector.load %arg5[%c0_66, %c0_67] : memref<128x128xbf16, #tpu.memory_space<vmem>>, vector<128x128xbf16>
      %cst_68 = arith.constant dense<0.000000e+00> : vector<16x128xf32>
      %122 = tpu.matmul %120, %121, %cst_68 {dimension_numbers = #tpu.dot_dimension_numbers<[1], [0], [0], [1], [0, 0, 1, 1], [], []>} : vector<16x128xbf16>, vector<128x128xbf16>, vector<16x128xf32> -> vector<16x128xf32>
      %c0_69 = arith.constant 0 : index
      %c0_70 = arith.constant 0 : index
      %123 = vector.load %arg2[%c0_69, %c0_70] : memref<16x128xf32, #tpu.memory_space<vmem>>, vector<16x128xf32>
      %124 = arith.addf %122, %123 : vector<16x128xf32>
      %c0_71 = arith.constant 0 : index
      %c0_72 = arith.constant 0 : index
      %125 = vector.load %arg21[%c0_71, %c0_72] : memref<16x128xf32, #tpu.memory_space<vmem>>, vector<16x128xf32>
      tpu.vector_store %arg21[%c0_71, %c0_72], %124 {strides = array<i32>} : memref<16x128xf32, #tpu.memory_space<vmem>>, vector<16x128xf32>,
    } else {
    }
    %c0 = arith.constant 0 : index
    %c0_1 = arith.constant 0 : index
    %3 = vector.load %arg21[%c0, %c0_1] : memref<16x128xf32, #tpu.memory_space<vmem>>, vector<16x128xf32>
    %c0_2 = arith.constant 0 : index
    %c0_3 = arith.constant 0 : index
    %4 = vector.load %arg4[%c0_2, %c0_3] : memref<128x128xf32, #tpu.memory_space<vmem>>, vector<128x128xf32>
    %c0_4 = arith.constant 0 : index
    %c0_5 = arith.constant 0 : index
    %c0_6 = arith.constant 0 : index
    %5 = vector.load %arg8[%c0_4, %c0_5, %c0_6] : memref<1x128x384xbf16, #tpu.memory_space<vmem>>, vector<1x128x384xbf16>
    %6 = vector.shape_cast %5 : vector<1x128x384xbf16> to vector<128x384xbf16>
    %c0_7 = arith.constant 0 : index
    %c0_8 = arith.constant 0 : index
    %c0_9 = arith.constant 0 : index
    %7 = vector.load %arg9[%c0_7, %c0_8, %c0_9] : memref<1x1x384xf32, #tpu.memory_space<vmem>>, vector<1x1x384xf32>
    %8 = vector.shape_cast %7 : vector<1x1x384xf32> to vector<1x384xf32>
    %9 = arith.truncf %3 : vector<16x128xf32> to vector<16x128xbf16>
    %cst = arith.constant dense<0.000000e+00> : vector<16x384xf32>
    %10 = tpu.matmul %9, %6, %cst {dimension_numbers = #tpu.dot_dimension_numbers<[1], [0], [0], [1], [0, 0, 1, 1], [], []>} : vector<16x128xbf16>, vector<128x384xbf16>, vector<16x384xf32> -> vector<16x384xf32>
    %11 = vector.broadcast %8 : vector<1x384xf32> to vector<16x384xf32>
    %12 = arith.addf %10, %11 : vector<16x384xf32>
    %13 = vector.extract_strided_slice %12 {offsets = [0, 0], sizes = [16, 128], strides = [1, 1]} : vector<16x384xf32> to vector<16x128xf32>
    %cst_10 = arith.constant 2.500000e-01 : f32
    %14 = vector.broadcast %cst_10 : f32 to vector<16x128xf32>
    %15 = arith.mulf %13, %14 : vector<16x128xf32>
    %16 = vector.extract_strided_slice %12 {offsets = [0, 128], sizes = [16, 128], strides = [1, 1]} : vector<16x384xf32> to vector<16x128xf32>
    %17 = vector.extract_strided_slice %12 {offsets = [0, 256], sizes = [16, 128], strides = [1, 1]} : vector<16x384xf32> to vector<16x128xf32>
    %18 = tpu.transpose %16, [1, 0] : vector<16x128xf32> -> vector<128x16xf32>
    %19 = tpu.concatenate %18, %18, %18, %18, %18, %18, %18, %18 in 1 : vector<128x16xf32>, vector<128x16xf32>, vector<128x16xf32>, vector<128x16xf32>, vector<128x16xf32>, vector<128x16xf32>, vector<128x16xf32>, vector<128x16xf32> -> vector<128x128xf32>
    %20 = arith.mulf %19, %4 : vector<128x128xf32>
    %cst_11 = arith.constant dense<0.000000e+00> : vector<16x128xf32>
    %21 = tpu.matmul %15, %20, %cst_11 {dimension_numbers = #tpu.dot_dimension_numbers<[1], [0], [0], [1], [0, 0, 1, 1], [], []>} : vector<16x128xf32>, vector<128x128xf32>, vector<16x128xf32> -> vector<16x128xf32>
    %c0_12 = arith.constant 0 : index
    %c0_13 = arith.constant 0 : index
    %22 = vector.load %arg3[%c0_12, %c0_13] : memref<16x128xf32, #tpu.memory_space<vmem>>, vector<16x128xf32>
    %23 = arith.addf %21, %22 : vector<16x128xf32>
    %cst_14 = arith.constant dense<0xFF800000> : vector<16xf32>
    %24 = vector.multi_reduction <maximumf>, %23, %cst_14 [1] : vector<16x128xf32> to vector<16xf32>
    %25 = vector.shape_cast %24 : vector<16xf32> to vector<16x1xf32>
    %26 = vector.broadcast %25 : vector<16x1xf32> to vector<16x128xf32>
    %27 = arith.subf %23, %26 : vector<16x128xf32>
    %28 = math.exp %27 : vector<16x128xf32>
    %cst_15 = arith.constant dense<0.000000e+00> : vector<16x128xf32>
    %29 = tpu.matmul %28, %4, %cst_15 {dimension_numbers = #tpu.dot_dimension_numbers<[1], [0], [0], [1], [0, 0, 1, 1], [], []>} : vector<16x128xf32>, vector<128x128xf32>, vector<16x128xf32> -> vector<16x128xf32>
    %30 = tpu.reciprocal %29 {approx = true} : vector<16x128xf32> -> vector<16x128xf32>
    %31 = arith.mulf %28, %30 : vector<16x128xf32>
    %32 = tpu.concatenate %17, %17, %17, %17, %17, %17, %17, %17 in 0 : vector<16x128xf32>, vector<16x128xf32>, vector<16x128xf32>, vector<16x128xf32>, vector<16x128xf32>, vector<16x128xf32>, vector<16x128xf32>, vector<16x128xf32> -> vector<128x128xf32>
    %33 = arith.mulf %32, %4 : vector<128x128xf32>
    %cst_16 = arith.constant dense<0.000000e+00> : vector<16x128xf32>
    %34 = tpu.matmul %31, %33, %cst_16 {dimension_numbers = #tpu.dot_dimension_numbers<[1], [0], [0], [1], [0, 0, 1, 1], [], []>} : vector<16x128xf32>, vector<128x128xf32>, vector<16x128xf32> -> vector<16x128xf32>
    %c0_17 = arith.constant 0 : index
    %c0_18 = arith.constant 0 : index
    %c0_19 = arith.constant 0 : index
    %35 = vector.load %arg10[%c0_17, %c0_18, %c0_19] : memref<1x128x128xbf16, #tpu.memory_space<vmem>>, vector<1x128x128xbf16>
    %36 = vector.shape_cast %35 : vector<1x128x128xbf16> to vector<128x128xbf16>
    %c0_20 = arith.constant 0 : index
    %c0_21 = arith.constant 0 : index
    %c0_22 = arith.constant 0 : index
    %37 = vector.load %arg11[%c0_20, %c0_21, %c0_22] : memref<1x1x128xf32, #tpu.memory_space<vmem>>, vector<1x1x128xf32>
    %38 = vector.shape_cast %37 : vector<1x1x128xf32> to vector<1x128xf32>
    %39 = arith.truncf %34 : vector<16x128xf32> to vector<16x128xbf16>
    %cst_23 = arith.constant dense<0.000000e+00> : vector<16x128xf32>
    %40 = tpu.matmul %39, %36, %cst_23 {dimension_numbers = #tpu.dot_dimension_numbers<[1], [0], [0], [1], [0, 0, 1, 1], [], []>} : vector<16x128xbf16>, vector<128x128xbf16>, vector<16x128xf32> -> vector<16x128xf32>
    %41 = vector.broadcast %38 : vector<1x128xf32> to vector<16x128xf32>
    %42 = arith.addf %40, %41 : vector<16x128xf32>
    %43 = arith.addf %3, %42 : vector<16x128xf32>
    %c0_24 = arith.constant 0 : index
    %c0_25 = arith.constant 0 : index
    %c0_26 = arith.constant 0 : index
    %44 = vector.load %arg12[%c0_24, %c0_25, %c0_26] : memref<1x1x128xf32, #tpu.memory_space<vmem>>, vector<1x1x128xf32>
    %45 = vector.shape_cast %44 : vector<1x1x128xf32> to vector<1x128xf32>
    %c0_27 = arith.constant 0 : index
    %c0_28 = arith.constant 0 : index
    %c0_29 = arith.constant 0 : index
    %46 = vector.load %arg13[%c0_27, %c0_28, %c0_29] : memref<1x1x128xf32, #tpu.memory_space<vmem>>, vector<1x1x128xf32>
    %47 = vector.shape_cast %46 : vector<1x1x128xf32> to vector<1x128xf32>
    %cst_30 = arith.constant dense<0.000000e+00> : vector<16xf32>
    %48 = vector.multi_reduction <add>, %43, %cst_30 [1] : vector<16x128xf32> to vector<16xf32>
    %49 = vector.shape_cast %48 : vector<16xf32> to vector<16x1xf32>
    %cst_31 = arith.constant 1.280000e+02 : f32
    %50 = vector.broadcast %cst_31 : f32 to vector<16x1xf32>
    %51 = arith.divf %49, %50 : vector<16x1xf32>
    %52 = arith.mulf %43, %43 : vector<16x128xf32>
    %cst_32 = arith.constant dense<0.000000e+00> : vector<16xf32>
    %53 = vector.multi_reduction <add>, %52, %cst_32 [1] : vector<16x128xf32> to vector<16xf32>
    %54 = vector.shape_cast %53 : vector<16xf32> to vector<16x1xf32>
    %cst_33 = arith.constant 1.280000e+02 : f32
    %55 = vector.broadcast %cst_33 : f32 to vector<16x1xf32>
    %56 = arith.divf %54, %55 : vector<16x1xf32>
    %57 = arith.mulf %51, %51 : vector<16x1xf32>
    %58 = arith.subf %56, %57 : vector<16x1xf32>
    %59 = vector.broadcast %51 : vector<16x1xf32> to vector<16x128xf32>
    %60 = arith.subf %43, %59 : vector<16x128xf32>
    %cst_34 = arith.constant 9.99999974E-6 : f32
    %61 = vector.broadcast %cst_34 : f32 to vector<16x1xf32>
    %62 = arith.addf %58, %61 : vector<16x1xf32>
    %63 = math.rsqrt %62 : vector<16x1xf32>
    %64 = vector.broadcast %63 : vector<16x1xf32> to vector<16x128xf32>
    %65 = arith.mulf %60, %64 : vector<16x128xf32>
    %66 = vector.broadcast %45 : vector<1x128xf32> to vector<16x128xf32>
    %67 = arith.mulf %65, %66 : vector<16x128xf32>
    %68 = vector.broadcast %47 : vector<1x128xf32> to vector<16x128xf32>
    %69 = arith.addf %67, %68 : vector<16x128xf32>
    %c0_35 = arith.constant 0 : index
    %c0_36 = arith.constant 0 : index
    %c0_37 = arith.constant 0 : index
    %70 = vector.load %arg14[%c0_35, %c0_36, %c0_37] : memref<1x128x512xbf16, #tpu.memory_space<vmem>>, vector<1x128x512xbf16>
    %71 = vector.shape_cast %70 : vector<1x128x512xbf16> to vector<128x512xbf16>
    %c0_38 = arith.constant 0 : index
    %c0_39 = arith.constant 0 : index
    %c0_40 = arith.constant 0 : index
    %72 = vector.load %arg15[%c0_38, %c0_39, %c0_40] : memref<1x1x512xf32, #tpu.memory_space<vmem>>, vector<1x1x512xf32>
    %73 = vector.shape_cast %72 : vector<1x1x512xf32> to vector<1x512xf32>
    %74 = arith.truncf %69 : vector<16x128xf32> to vector<16x128xbf16>
    %cst_41 = arith.constant dense<0.000000e+00> : vector<16x512xf32>
    %75 = tpu.matmul %74, %71, %cst_41 {dimension_numbers = #tpu.dot_dimension_numbers<[1], [0], [0], [1], [0, 0, 1, 1], [], []>} : vector<16x128xbf16>, vector<128x512xbf16>, vector<16x512xf32> -> vector<16x512xf32>
    %76 = vector.broadcast %73 : vector<1x512xf32> to vector<16x512xf32>
    %77 = arith.addf %75, %76 : vector<16x512xf32>
    %cst_42 = arith.constant 0.000000e+00 : f32
    %78 = vector.broadcast %cst_42 : f32 to vector<16x512xf32>
    %79 = arith.maximumf %77, %78 : vector<16x512xf32>
    %c0_43 = arith.constant 0 : index
    %c0_44 = arith.constant 0 : index
    %c0_45 = arith.constant 0 : index
    %80 = vector.load %arg16[%c0_43, %c0_44, %c0_45] : memref<1x512x128xbf16, #tpu.memory_space<vmem>>, vector<1x512x128xbf16>
    %81 = vector.shape_cast %80 : vector<1x512x128xbf16> to vector<512x128xbf16>
    %c0_46 = arith.constant 0 : index
    %c0_47 = arith.constant 0 : index
    %c0_48 = arith.constant 0 : index
    %82 = vector.load %arg17[%c0_46, %c0_47, %c0_48] : memref<1x1x128xf32, #tpu.memory_space<vmem>>, vector<1x1x128xf32>
    %83 = vector.shape_cast %82 : vector<1x1x128xf32> to vector<1x128xf32>
    %84 = arith.truncf %79 : vector<16x512xf32> to vector<16x512xbf16>
    %cst_49 = arith.constant dense<0.000000e+00> : vector<16x128xf32>
    %85 = tpu.matmul %84, %81, %cst_49 {dimension_numbers = #tpu.dot_dimension_numbers<[1], [0], [0], [1], [0, 0, 1, 1], [], []>} : vector<16x512xbf16>, vector<512x128xbf16>, vector<16x128xf32> -> vector<16x128xf32>
    %86 = vector.broadcast %83 : vector<1x128xf32> to vector<16x128xf32>
    %87 = arith.addf %85, %86 : vector<16x128xf32>
    %88 = arith.addf %69, %87 : vector<16x128xf32>
    %c0_50 = arith.constant 0 : index
    %c0_51 = arith.constant 0 : index
    %c0_52 = arith.constant 0 : index
    %89 = vector.load %arg18[%c0_50, %c0_51, %c0_52] : memref<1x1x128xf32, #tpu.memory_space<vmem>>, vector<1x1x128xf32>
    %90 = vector.shape_cast %89 : vector<1x1x128xf32> to vector<1x128xf32>
    %c0_53 = arith.constant 0 : index
    %c0_54 = arith.constant 0 : index
    %c0_55 = arith.constant 0 : index
    %91 = vector.load %arg19[%c0_53, %c0_54, %c0_55] : memref<1x1x128xf32, #tpu.memory_space<vmem>>, vector<1x1x128xf32>
    %92 = vector.shape_cast %91 : vector<1x1x128xf32> to vector<1x128xf32>
    %cst_56 = arith.constant dense<0.000000e+00> : vector<16xf32>
    %93 = vector.multi_reduction <add>, %88, %cst_56 [1] : vector<16x128xf32> to vector<16xf32>
    %94 = vector.shape_cast %93 : vector<16xf32> to vector<16x1xf32>
    %cst_57 = arith.constant 1.280000e+02 : f32
    %95 = vector.broadcast %cst_57 : f32 to vector<16x1xf32>
    %96 = arith.divf %94, %95 : vector<16x1xf32>
    %97 = arith.mulf %88, %88 : vector<16x128xf32>
    %cst_58 = arith.constant dense<0.000000e+00> : vector<16xf32>
    %98 = vector.multi_reduction <add>, %97, %cst_58 [1] : vector<16x128xf32> to vector<16xf32>
    %99 = vector.shape_cast %98 : vector<16xf32> to vector<16x1xf32>
    %cst_59 = arith.constant 1.280000e+02 : f32
    %100 = vector.broadcast %cst_59 : f32 to vector<16x1xf32>
    %101 = arith.divf %99, %100 : vector<16x1xf32>
    %102 = arith.mulf %96, %96 : vector<16x1xf32>
    %103 = arith.subf %101, %102 : vector<16x1xf32>
    %104 = vector.broadcast %96 : vector<16x1xf32> to vector<16x128xf32>
    %105 = arith.subf %88, %104 : vector<16x128xf32>
    %cst_60 = arith.constant 9.99999974E-6 : f32
    %106 = vector.broadcast %cst_60 : f32 to vector<16x1xf32>
    %107 = arith.addf %103, %106 : vector<16x1xf32>
    %108 = math.rsqrt %107 : vector<16x1xf32>
    %109 = vector.broadcast %108 : vector<16x1xf32> to vector<16x128xf32>
    %110 = arith.mulf %105, %109 : vector<16x128xf32>
    %111 = vector.broadcast %90 : vector<1x128xf32> to vector<16x128xf32>
    %112 = arith.mulf %110, %111 : vector<16x128xf32>
    %113 = vector.broadcast %92 : vector<1x128xf32> to vector<16x128xf32>
    %114 = arith.addf %112, %113 : vector<16x128xf32>
    %c0_61 = arith.constant 0 : index
    %c0_62 = arith.constant 0 : index
    %115 = vector.load %arg21[%c0_61, %c0_62] : memref<16x128xf32, #tpu.memory_space<vmem>>, vector<16x128xf32>
    tpu.vector_store %arg21[%c0_61, %c0_62], %114 {strides = array<i32>} : memref<16x128xf32, #tpu.memory_space<vmem>>, vector<16x128xf32>,
    %c3_i32 = arith.constant 3 : i32
    %116 = arith.cmpi eq, %arg0, %c3_i32 : i32
    %117 = arith.extui %116 : i1 to i32
    %c0_i32_63 = arith.constant 0 : i32
    %118 = arith.cmpi ne, %117, %c0_i32_63 : i32
    scf.if %118 {
      %119 = arith.truncf %114 : vector<16x128xf32> to vector<16x128xbf16>
      %c0_64 = arith.constant 0 : index
      %c0_65 = arith.constant 0 : index
      %120 = vector.load %arg6[%c0_64, %c0_65] : memref<128x128xbf16, #tpu.memory_space<vmem>>, vector<128x128xbf16>
      %cst_66 = arith.constant dense<0.000000e+00> : vector<16x128xf32>
      %121 = tpu.matmul %119, %120, %cst_66 {dimension_numbers = #tpu.dot_dimension_numbers<[1], [0], [0], [1], [0, 0, 1, 1], [], []>} : vector<16x128xbf16>, vector<128x128xbf16>, vector<16x128xf32> -> vector<16x128xf32>
      %c0_67 = arith.constant 0 : index
      %c0_68 = arith.constant 0 : index
      %122 = vector.load %arg7[%c0_67, %c0_68] : memref<1x128xf32, #tpu.memory_space<vmem>>, vector<1x128xf32>
      %123 = vector.broadcast %122 : vector<1x128xf32> to vector<16x128xf32>
      %124 = arith.addf %121, %123 : vector<16x128xf32>
      %c0_69 = arith.constant 0 : index
      %c0_70 = arith.constant 0 : index
      %125 = vector.load %arg20[%c0_69, %c0_70] : memref<16x128xf32, #tpu.memory_space<vmem>>, vector<16x128xf32>
      tpu.vector_store %arg20[%c0_69, %c0_70], %124 {strides = array<i32>} : memref<16x128xf32, #tpu.memory_space<vmem>>, vector<16x128xf32>,
    } else {
    }
    return
  }
  func.func @transform_0(%arg0: i32) -> (i32, i32) {
    %c0_i32 = arith.constant 0 : i32
    %c0_i32_0 = arith.constant 0 : i32
    %c0_i32_1 = arith.constant 0 : i32
    return %c0_i32, %c0_i32_0 : i32, i32
  }
  func.func @transform_1(%arg0: i32) -> (i32, i32) {
    %c0_i32 = arith.constant 0 : i32
    %c0_i32_0 = arith.constant 0 : i32
    %c0_i32_1 = arith.constant 0 : i32
    return %c0_i32, %c0_i32_0 : i32, i32
  }
  func.func @transform_2(%arg0: i32) -> (i32, i32) {
    %c0_i32 = arith.constant 0 : i32
    %c0_i32_0 = arith.constant 0 : i32
    %c0_i32_1 = arith.constant 0 : i32
    return %c0_i32, %c0_i32_0 : i32, i32
  }
  func.func @transform_3(%arg0: i32) -> (i32, i32) {
    %c0_i32 = arith.constant 0 : i32
    %c0_i32_0 = arith.constant 0 : i32
    %c0_i32_1 = arith.constant 0 : i32
    return %c0_i32, %c0_i32_0 : i32, i32
  }
  func.func @transform_4(%arg0: i32) -> (i32, i32) {
    %c0_i32 = arith.constant 0 : i32
    %c0_i32_0 = arith.constant 0 : i32
    %c0_i32_1 = arith.constant 0 : i32
    return %c0_i32, %c0_i32_0 : i32, i32
  }
  func.func @transform_5(%arg0: i32) -> (i32, i32) {
    %c0_i32 = arith.constant 0 : i32
    %c0_i32_0 = arith.constant 0 : i32
    %c0_i32_1 = arith.constant 0 : i32
    return %c0_i32, %c0_i32_0 : i32, i32
  }
  func.func @transform_6(%arg0: i32) -> (i32, i32) {
    %c0_i32 = arith.constant 0 : i32
    %c0_i32_0 = arith.constant 0 : i32
    %c0_i32_1 = arith.constant 0 : i32
    return %c0_i32, %c0_i32_0 : i32, i32
  }
  func.func @transform_7(%arg0: i32) -> (i32, i32, i32) {
    %c0_i32 = arith.constant 0 : i32
    %c0_i32_0 = arith.constant 0 : i32
    %c0_i32_1 = arith.constant 0 : i32
    return %arg0, %c0_i32, %c0_i32_0 : i32, i32, i32
  }
  func.func @transform_8(%arg0: i32) -> (i32, i32, i32) {
    %c0_i32 = arith.constant 0 : i32
    %c0_i32_0 = arith.constant 0 : i32
    %c0_i32_1 = arith.constant 0 : i32
    return %arg0, %c0_i32, %c0_i32_0 : i32, i32, i32
  }
  func.func @transform_9(%arg0: i32) -> (i32, i32, i32) {
    %c0_i32 = arith.constant 0 : i32
    %c0_i32_0 = arith.constant 0 : i32
    %c0_i32_1 = arith.constant 0 : i32
    return %arg0, %c0_i32, %c0_i32_0 : i32, i32, i32
  }
  func.func @transform_10(%arg0: i32) -> (i32, i32, i32) {
    %c0_i32 = arith.constant 0 : i32
    %c0_i32_0 = arith.constant 0 : i32
    %c0_i32_1 = arith.constant 0 : i32
    return %arg0, %c0_i32, %c0_i32_0 : i32, i32, i32
  }
  func.func @transform_11(%arg0: i32) -> (i32, i32, i32) {
    %c0_i32 = arith.constant 0 : i32
    %c0_i32_0 = arith.constant 0 : i32
    %c0_i32_1 = arith.constant 0 : i32
    return %arg0, %c0_i32, %c0_i32_0 : i32, i32, i32
  }
  func.func @transform_12(%arg0: i32) -> (i32, i32, i32) {
    %c0_i32 = arith.constant 0 : i32
    %c0_i32_0 = arith.constant 0 : i32
    %c0_i32_1 = arith.constant 0 : i32
    return %arg0, %c0_i32, %c0_i32_0 : i32, i32, i32
  }
  func.func @transform_13(%arg0: i32) -> (i32, i32, i32) {
    %c0_i32 = arith.constant 0 : i32
    %c0_i32_0 = arith.constant 0 : i32
    %c0_i32_1 = arith.constant 0 : i32
    return %arg0, %c0_i32, %c0_i32_0 : i32, i32, i32
  }
  func.func @transform_14(%arg0: i32) -> (i32, i32, i32) {
    %c0_i32 = arith.constant 0 : i32
    %c0_i32_0 = arith.constant 0 : i32
    %c0_i32_1 = arith.constant 0 : i32
    return %arg0, %c0_i32, %c0_i32_0 : i32, i32, i32
  }
  func.func @transform_15(%arg0: i32) -> (i32, i32, i32) {
    %c0_i32 = arith.constant 0 : i32
    %c0_i32_0 = arith.constant 0 : i32
    %c0_i32_1 = arith.constant 0 : i32
    return %arg0, %c0_i32, %c0_i32_0 : i32, i32, i32
  }
  func.func @transform_16(%arg0: i32) -> (i32, i32, i32) {
    %c0_i32 = arith.constant 0 : i32
    %c0_i32_0 = arith.constant 0 : i32
    %c0_i32_1 = arith.constant 0 : i32
    return %arg0, %c0_i32, %c0_i32_0 : i32, i32, i32
  }
  func.func @transform_17(%arg0: i32) -> (i32, i32, i32) {
    %c0_i32 = arith.constant 0 : i32
    %c0_i32_0 = arith.constant 0 : i32
    %c0_i32_1 = arith.constant 0 : i32
    return %arg0, %c0_i32, %c0_i32_0 : i32, i32, i32
  }
  func.func @transform_18(%arg0: i32) -> (i32, i32, i32) {
    %c0_i32 = arith.constant 0 : i32
    %c0_i32_0 = arith.constant 0 : i32
    %c0_i32_1 = arith.constant 0 : i32
    return %arg0, %c0_i32, %c0_i32_0 : i32, i32, i32
  }
  func.func @transform_19(%arg0: i32) -> (i32, i32) {
    %c0_i32 = arith.constant 0 : i32
    %c0_i32_0 = arith.constant 0 : i32
    %c0_i32_1 = arith.constant 0 : i32
    return %c0_i32, %c0_i32_0 : i32, i32
  }
}

</mosaic_0001>

<bundles_post_ra>
// kernel: tpu_custom_call.1
= control target key start
LH: loop header
LB: loop body
LE: loop exit
PB: predicated region body
PF: predicated region fallthrough
CT: control target
= control target key end

     0   :  { %s5923_s0 = inlined_call_operand.hbm [shape: f32[16,128], index: 0, kind: input, shape index: {}]   ;;  %s5924_s1 = inlined_call_operand.hbm [shape: f32[16,128], index: 1, kind: input, shape index: {}]   ;;  %s5925_s2 = inlined_call_operand.hbm [shape: f32[16,128], index: 2, kind: input, shape index: {}]   ;;  %s5926_s3 = inlined_call_operand.hbm [shape: f32[128,128], index: 3, kind: input, shape index: {}]   ;;  %s5927_s4 = inlined_call_operand.hbm [shape: bf16[128,128], index: 4, kind: input, shape index: {}]   ;;  %s5928_s5 = inlined_call_operand.hbm [shape: bf16[128,128], index: 5, kind: input, shape index: {}]   ;;  %s5929_s6 = inlined_call_operand.vmem [shape: f32[1,128], index: 6, kind: input, shape index: {}]   ;;  %s5930_s7 = inlined_call_operand.hbm [shape: bf16[4,128,384], index: 7, kind: input, shape index: {}]   ;;  %s5931_s8 = inlined_call_operand.vmem [shape: f32[4,1,384], index: 8, kind: input, shape index: {}]   ;;  %s5932_s9 = inlined_call_operand.hbm [shape: bf16[4,128,128], index: 9, kind: input, shape index: {}]   ;;  %s5933_s10 = inlined_call_operand.vmem [shape: f32[4,1,128], index: 10, kind: input, shape index: {}]   ;;  %s5934_s11 = inlined_call_operand.vmem [shape: f32[4,1,128], index: 11, kind: input, shape index: {}]   ;;  %s5935_s12 = inlined_call_operand.vmem [shape: f32[4,1,128], index: 12, kind: input, shape index: {}]   ;;  %s5936_s13 = inlined_call_operand.hbm [shape: bf16[4,128,512], index: 13, kind: input, shape index: {}]   ;;  %s5937_s14 = inlined_call_operand.vmem [shape: f32[4,1,512], index: 14, kind: input, shape index: {}]   ;;  %s5938_s15 = inlined_call_operand.hbm [shape: bf16[4,512,128], index: 15, kind: input, shape index: {}]   ;;  %s5939_s16 = inlined_call_operand.vmem [shape: f32[4,1,128], index: 16, kind: input, shape index: {}]   ;;  %s5940_s17 = inlined_call_operand.vmem [shape: f32[4,1,128], index: 17, kind: input, shape index: {}]   ;;  %s5941_s18 = inlined_call_operand.vmem [shape: f32[4,1,128], index: 18, kind: input, shape index: {}]   ;;  %s5942_s19 = inlined_call_operand.hbm [shape: f32[16,128], index: 19, kind: output, shape index: {}]  }
   0x1   :  { %5979 = sst [smem:[#allocation29_spill]] %s5923_s0 }
   0x2   :  { %5980 = sst [smem:[#allocation30_spill]] %s5924_s1 }
   0x3   :  { %5981 = sst [smem:[#allocation31_spill]] %s5925_s2 }
   0x4   :  { %5982 = sst [smem:[#allocation32_spill]] %s5926_s3 }
   0x5   :  { %5983 = sst [smem:[#allocation33_spill]] %s5927_s4 }
   0x6   :  { %5984 = sst [smem:[#allocation34_spill]] %s5929_s6 }
   0x7   :  { %5985 = sst [smem:[#allocation35_spill]] %s5930_s7 }
   0x8   :  { %5986 = sst [smem:[#allocation36_spill]] %s5931_s8 }
   0x9   :  { %5987 = sst [smem:[#allocation37_spill]] %s5932_s9 }
   0xa   :  { %5988 = sst [smem:[#allocation38_spill]] %s5933_s10 }
   0xb   :  { %5989 = sst [smem:[#allocation39_spill]] %s5934_s11 }
   0xc   :  { %5990 = sst [smem:[#allocation40_spill]] %s5935_s12 }
   0xd   :  { %5991 = sst [smem:[#allocation41_spill]] %s5936_s13 }
   0xe   :  { %5992 = sst [smem:[#allocation42_spill]] %s5937_s14 }
   0xf   :  { %5993 = sst [smem:[#allocation43_spill]] %s5939_s16 }
  0x10   :  { %5994 = sst [smem:[#allocation44_spill]] %s5940_s17 }
  0x11   :  { %5995 = sst [smem:[#allocation45_spill]] %s5941_s18 }
  0x12   :  { %5996 = sst [smem:[#allocation46_spill]] %s5942_s19 }
  0x13   :  { %24 = vsyncpa [#allocation4], 0 }
  0x14   :  { %25 = vsyncpa [#allocation7], 0 }
  0x15   :  { %26 = vsyncpa [#allocation10], 0 }
  0x16   :  { %27 = vsyncpa [#allocation13], 0 }
  0x17   :  { %28 = vsyncpa [#allocation5], 0  ;;  %s4719_s0 = smov 0   ;;  %s4721_s30 = smov 0  }
  0x18   :  { %s4723_s20 = smov 0   ;;  %s4725_s21 = smov 0  }
  0x19 LB: > { %5997 = sst [smem:[#allocation25_spill]] %s4578_s20  ;;  %s4584_s1 = smov [#allocation3]   ;;  %s4582_s21 = sphi %s4725_s21, %s6060_s21   ;;  %s4578_s20 = sphi %s4723_s20, %s6062_s20   ;;  %s4574_s30 = sphi %s4721_s30, %s6064_s30   ;;  %s4570_s0 = sphi %s4719_s0, %s6063_s0  }
  0x1a   : > { %s531_s22 = sshll.u32 %s4584_s1, 4  ;;  %s4740_s2 = sadd.s32 4294967295, %s4582_s21   ;;  %s532_s22 = int_to_ptr.vmem [resolvable:$true] %s531_s22 }
  0x1b   : > { %p3338_p0 = scmp.ge.s32.totalorder %s4582_s21, 1  ;;  %p5948_p1 = scmp.eq.s32.totalorder %s4740_s2, 0 }
  0x1c   : > { %p519_p2 = scmp.lt.s32.totalorder %s4582_s21, 5  ;;  %s4759_s25 = sadd.s32 1, %s4582_s21  }
  0x1d   : > { %6000 = sst [smem:[#allocation26_spill]] %s4759_s25  ;;  %s6001_s27 = sld [smem:[#allocation29_spill]] }
  0x1e   : > { %p4746_p4 = pnand %p3338_p0, %p519_p2 }
  0x20   : > { %s5998_s23 = scalar_select %p4746_p4, 1, 0 }
  0x21   : > { %p3950_p5 = pneg %p4746_p4 }
  0x23   : > { %p4754_p6 = pnand %p3950_p5, %p5948_p1  ;;  %s4214_s28 = scalar_lea.hbm %s6001_s27, 256 }
  0x24   : > { %p4215_p7 = scmp.ne.s32.totalorder %s6001_s27, %s4214_s28  ;;  %p4221_p11 = scmp.lt.u32.totalorder %s4214_s28, %s6001_s27 }
  0x25   : > { %s5999_s24 = scalar_select %p4754_p6, 1, 0 }
  0x26   : > { %p4769_p8 = pneg %p4754_p6 }
  0x28   : > { %s6002_s19 = scalar_select %p4769_p8, 1, 0 }
  0x29   : > { %p4217_p9 = pnand %p4769_p8, %p4215_p7 }
  0x2b   : > { %p4218_p10 = pneg %p4217_p9 }
  0x2d   : > { %p4223_p12 = pnand %p4221_p11, %p4218_p10 }
  0x2f   : > { %4226 = shalt.err (!%p4223_p12)
}
  0x30   : > { %s4227_s3 = scalar_lea.vmem %s532_s22, 256  ;;  %p4235_p5 = scmp.lt.s32.totalorder %s532_s22, %s532_s22 }
  0x31   : > { %p4228_p13 = scmp.ne.s32.totalorder %s532_s22, %s4227_s3  ;;  %p4236_p3 = scmp.lt.s32.totalorder %s4227_s3, %s4227_s3 }
  0x33   : > { %p4230_p0 = pnand %p4228_p13, %p4769_p8  ;;  %p4237_p1 = por %p4236_p3, %p4235_p5 }
  0x35   : > { %p4231_p2 = pneg %p4230_p0 }
  0x37   : > { %p4238_p4 = pnand %p4237_p1, %p4231_p2 }
  0x39   : > { %4241 = shalt.err (!%p4238_p4)
}
  0x3a   : > { %s5950_s26 = smov 128   ;;  %s5952_s6 = smov 8  }
  0x3b   : > { %3953 = dma.hbm_to_vmem [thread:$0]  (!%p4754_p6), %s6001_s27, 256, %s532_s22, [#allocation4], %s5950_s26, %s5950_s26, %s5952_s6  }
  0x3c   : > { %s185_s29 = ssub.s32 %s4582_s21, %s4759_s25  ;;  %s188_s1 = sadd.s32 1, %s4578_s20 }
  0x3d   : > { %p186_p1 = scmp.eq.s32.totalorder %s185_s29, 0  ;;  %p195_p3 = scmp.ne.s32.totalorder %s4578_s20, %s4574_s30 }
  0x3e   : > { %p196_p4 = scmp.eq.s32.totalorder %s4582_s21, 0  ;;  %p201_p7 = scmp.ne.s32.totalorder %s4574_s30, %s4570_s0 }
  0x3f   : > { %s4797_s3 = scalar_select %p186_p1, %s4578_s20, %s188_s1  }
  0x40   : > { %p197_p9 = por %p196_p4, %p195_p3  ;;  %p6004_p10 = scmp.eq.s32.totalorder %s4740_s2, 0 }
  0x41   : > { %6003 = sst [smem:[#allocation27_spill]] %s4797_s3  ;;  %p3988_p12 = scmp.lt.s32.totalorder %s4582_s21, 4 }
  0x42   : > { %p4801_p11 = por %p6004_p10, %p201_p7  ;;  %s613_s16 = sand.u32 1, %s4582_s21  }
  0x43   : > { %s4808_s14 = sand.u32 1, %s4578_s20   ;;  %p4811_p13 = pnand %p3988_p12, %p197_p9 }
  0x44   : > { %s6005_s17 = scalar_select %p4801_p11, 1, 0 }
  0x45   : > { %s3910_s22 = smul.u32 192, %s4808_s14  ;;  %s6008_s7 = sld [smem:[#allocation35_spill]] }
  0x46   : > { %6006 = sst [smem:[#allocation28_spill]] %s6005_s17  ;;  %s3911_s0 = smul.u32 3072, %s4582_s21 }
  0x47   : > { %s6007_s18 = scalar_select %p4811_p13, 1, 0 }
  0x48   : > { %s617_s26 = scalar_lea.vmem [#allocation14], %s3910_s22  ;;  %s4823_s27 = scalar_lea.sflag [#allocation4], %s613_s16 }
  0x49   : > { %s624_s6 = sshll.u32 %s617_s26, 4  ;;  %p4829_p2 = pneg %p4811_p13  ;;  %s4821_s6 = int_to_ptr.vmem [resolvable:$true] %s624_s6 }
  0x4b   : > { %s4819_s1 = scalar_lea.hbm %s6008_s7, %s3911_s0  ;;  %s4247_s22 = scalar_lea.hbm %s6008_s7, 12288 }
  0x4c   : > { %s4242_s3 = scalar_lea.hbm %s4819_s1, 3072  ;;  %p4248_p3 = scmp.lt.u32.totalorder %s4819_s1, %s6008_s7 }
  0x4d   : > { %p4243_p0 = scmp.ne.s32.totalorder %s4819_s1, %s4242_s3  ;;  %p4249_p4 = scmp.lt.u32.totalorder %s4247_s22, %s4242_s3 }
  0x4e   : > { %s6009_s20 = scalar_select %p4829_p2, 1, 0 }
  0x4f   : > { %p4245_p5 = pnand %p4829_p2, %p4243_p0  ;;  %p4250_p7 = por %p4249_p4, %p4248_p3 }
  0x50   : > { %p4251_p9 = scmp.lt.u32.totalorder %s4242_s3, %s4819_s1 }
  0x51   : > { %p4246_p1 = pneg %p4245_p5 }
  0x52   : > { %p4252_p10 = por %p4251_p9, %p4250_p7 }
  0x54   : > { %p4253_p12 = pnand %p4252_p10, %p4246_p1 }
  0x56   : > { %4256 = shalt.err (!%p4253_p12)
}
  0x57   : > { %s4257_s16 = scalar_lea.vmem %s4821_s6, 3072  ;;  %s4587_s0 = smov [#allocation14]  }
  0x58   : > { %p4258_p0 = scmp.ne.s32.totalorder %s4821_s6, %s4257_s16  ;;  %s4262_s28 = sshll.u32 %s4587_s0, 4  ;;  %s4263_s28 = int_to_ptr.vmem [resolvable:$false] %s4262_s28 }
  0x59   : > { %s4264_s26 = scalar_lea.vmem %s4263_s28, 6144  ;;  %p4265_p6 = scmp.lt.s32.totalorder %s4821_s6, %s4263_s28 }
  0x5a   : > { %p4260_p5 = pnand %p4258_p0, %p4829_p2  ;;  %p4266_p8 = scmp.lt.s32.totalorder %s4264_s26, %s4257_s16 }
  0x5c   : > { %p4261_p11 = pneg %p4260_p5  ;;  %p4267_p3 = por %p4266_p8, %p4265_p6 }
  0x5e   : > { %p4268_p4 = pnand %p4267_p3, %p4261_p11 }
  0x60   : > { %4271 = shalt.err (!%p4268_p4)
}
  0x61   : > { %s4588_s3 = smov 192   ;;  %s4589_s22 = smov 12  }
  0x62   : > { %3972 = dma.hbm_to_vmem [thread:$0]  (!%p4811_p13), %s4819_s1, 3072, %s4821_s6, %s4823_s27, %s4588_s3, %s4588_s3, %s4589_s22  }
  0x63   : > { %s3347_s29 = sshll.u32 %s4808_s14, 6  ;;  %s3492_s0 = sshll.u32 %s4582_s21, 10 }
  0x64   : > { %s6010_s9 = sld [smem:[#allocation37_spill]]  ;;  %s645_s28 = scalar_lea.vmem [#allocation15], %s3347_s29 }
  0x65   : > { %s652_s26 = sshll.u32 %s645_s28, 4  ;;  %s4590_s8 = smov [#allocation6]   ;;  %s4860_s26 = int_to_ptr.vmem [resolvable:$true] %s652_s26 }
  0x66   : > { %s4862_s12 = sshll.u32 %s4590_s8, 4  ;;  %s545_s12 = int_to_ptr.vmem [resolvable:$true] %s4862_s12 }
  0x6a   : > { %s4858_s16 = scalar_lea.hbm %s6010_s9, %s3492_s0  ;;  %s4277_s25 = scalar_lea.hbm %s6010_s9, 4096 }
  0x6b   : > { %s4272_s11 = scalar_lea.hbm %s4858_s16, 1024  ;;  %p4278_p1 = scmp.lt.u32.totalorder %s4858_s16, %s6010_s9 }
  0x6c   : > { %p4273_p6 = scmp.ne.s32.totalorder %s4858_s16, %s4272_s11  ;;  %p4279_p7 = scmp.lt.u32.totalorder %s4277_s25, %s4272_s11 }
  0x6d   : > { %p4281_p10 = scmp.lt.u32.totalorder %s4272_s11, %s4858_s16 }
  0x6e   : > { %p4275_p8 = pnand %p4273_p6, %p4829_p2  ;;  %p4280_p9 = por %p4279_p7, %p4278_p1 }
  0x70   : > { %p4276_p11 = pneg %p4275_p8  ;;  %p4282_p12 = por %p4281_p10, %p4280_p9 }
  0x72   : > { %p4283_p0 = pnand %p4282_p12, %p4276_p11 }
  0x74   : > { %4286 = shalt.err (!%p4283_p0)
}
  0x75   : > { %s4287_s8 = scalar_lea.vmem %s4860_s26, 1024  ;;  %s4591_s22 = smov [#allocation15]  }
  0x76   : > { %p4288_p5 = scmp.ne.s32.totalorder %s4860_s26, %s4287_s8  ;;  %s4292_s29 = sshll.u32 %s4591_s22, 4  ;;  %s4293_s29 = int_to_ptr.vmem [resolvable:$false] %s4292_s29 }
  0x77   : > { %s4294_s0 = scalar_lea.vmem %s4293_s29, 2048  ;;  %p4295_p6 = scmp.lt.s32.totalorder %s4860_s26, %s4293_s29 }
  0x78   : > { %p4290_p3 = pnand %p4288_p5, %p4829_p2  ;;  %p4296_p8 = scmp.lt.s32.totalorder %s4294_s0, %s4287_s8 }
  0x7a   : > { %p4291_p4 = pneg %p4290_p3  ;;  %p4297_p1 = por %p4296_p8, %p4295_p6 }
  0x7c   : > { %p4298_p7 = pnand %p4297_p1, %p4291_p4 }
  0x7e   : > { %4301 = shalt.err (!%p4298_p7)
}
  0x7f   : > { %s5965_s11 = smov 64   ;;  %s5967_s28 = smov 4  }
  0x80   : > { %3975 = dma.hbm_to_vmem [thread:$0]  (!%p4811_p13), %s4858_s16, 1024, %s4860_s26, %s4823_s27, %s5965_s11, %s5965_s11, %s5967_s28  }
  0x81   : > { %s6011_s25 = sld [smem:[#allocation30_spill]]  ;;  %p6012_p9 = scmp.ne.s32.totalorder %s6002_s19, 0 }
  0x87   : > { %s4302_s1 = scalar_lea.hbm %s6011_s25, 256 }
  0x88   : > { %p4303_p11 = scmp.ne.s32.totalorder %s6011_s25, %s4302_s1  ;;  %p4309_p0 = scmp.lt.u32.totalorder %s4302_s1, %s6011_s25 }
  0x8a   : > { %p4305_p10 = pnand %p4303_p11, %p6012_p9 }
  0x8c   : > { %p4306_p12 = pneg %p4305_p10 }
  0x8e   : > { %p4311_p5 = pnand %p4309_p0, %p4306_p12 }
  0x90   : > { %4314 = shalt.err (!%p4311_p5)
}
  0x91   : > { %s4315_s0 = scalar_lea.vmem %s545_s12, 256  ;;  %p4323_p8 = scmp.lt.s32.totalorder %s545_s12, %s545_s12 }
  0x92   : > { %p4316_p3 = scmp.ne.s32.totalorder %s545_s12, %s4315_s0  ;;  %p4324_p1 = scmp.lt.s32.totalorder %s4315_s0, %s4315_s0 }
  0x94   : > { %p4318_p4 = pnand %p4316_p3, %p6012_p9  ;;  %p4325_p7 = por %p4324_p1, %p4323_p8 }
  0x96   : > { %p4319_p6 = pneg %p4318_p4 }
  0x98   : > { %p4326_p13 = pnand %p4325_p7, %p4319_p6 }
  0x9a   : > { %4329 = shalt.err (!%p4326_p13)
}
  0x9b   : > { %p6013_p11 = scmp.ne.s32.totalorder %s5999_s24, 0  ;;  %s6014_s16 = smov 8  }
  0x9c   : > { %s6015_s26 = smov 128   ;;  %s4594_s1 = smov [#allocation9]  }
  0x9d   : > { %3956 = dma.hbm_to_vmem [thread:$0]  (!%p6013_p11), %s6011_s25, 256, %s545_s12, [#allocation7], %s6015_s26, %s6015_s26, %s6014_s16  }
  0x9e   : > { %s570_s3 = sshll.u32 %s4594_s1, 4  ;;  %s5974_s8 = sshll.u32 %s4808_s14, 8  ;;  %s571_s3 = int_to_ptr.vmem [resolvable:$true] %s570_s3 }
  0x9f   : > { %s6016_s0 = sld [smem:[#allocation32_spill]] }
  0xa5   : > { %s6017_s11 = smov %s6016_s0  ;;  %s4330_s28 = scalar_lea.hbm %s6016_s0, 2048 }
  0xa6   : > { %p4331_p13 = scmp.ne.s32.totalorder %s6017_s11, %s4330_s28  ;;  %p4337_p0 = scmp.lt.u32.totalorder %s4330_s28, %s6017_s11 }
  0xa8   : > { %p4333_p10 = pnand %p4331_p13, %p6012_p9 }
  0xaa   : > { %p4334_p12 = pneg %p4333_p10 }
  0xac   : > { %p4339_p5 = pnand %p4337_p0, %p4334_p12 }
  0xae   : > { %4342 = shalt.err (!%p4339_p5)
}
  0xaf   : > { %s4343_s12 = scalar_lea.vmem %s571_s3, 2048  ;;  %p4351_p8 = scmp.lt.s32.totalorder %s571_s3, %s571_s3 }
  0xb0   : > { %p4344_p3 = scmp.ne.s32.totalorder %s571_s3, %s4343_s12  ;;  %p4352_p1 = scmp.lt.s32.totalorder %s4343_s12, %s4343_s12 }
  0xb2   : > { %p4346_p4 = pnand %p4344_p3, %p6012_p9  ;;  %p4353_p7 = por %p4352_p1, %p4351_p8 }
  0xb4   : > { %p4347_p6 = pneg %p4346_p4 }
  0xb6   : > { %p4354_p2 = pnand %p4353_p7, %p4347_p6 }
  0xb8   : > { %4357 = shalt.err (!%p4354_p2)
}
  0xb9   : > { %3962 = dma.hbm_to_vmem [thread:$0]  (!%p6013_p11), %s6017_s11, 2048, %s571_s3, [#allocation10], %s6015_s26, %s6015_s26, %s6014_s16  }
  0xba   : > { %s5975_s17 = sshll.u32 %s4582_s21, 12  ;;  %s684_s28 = scalar_lea.vmem [#allocation16], %s5974_s8 }
  0xbb   : > { %s691_s7 = sshll.u32 %s684_s28, 4  ;;  %s6018_s13 = sld [smem:[#allocation41_spill]]  ;;  %s4943_s7 = int_to_ptr.vmem [resolvable:$true] %s691_s7 }
  0xbc   : > { %p6019_p13 = scmp.ne.s32.totalorder %s6009_s20, 0 }
  0xc1   : > { %s4941_s29 = scalar_lea.hbm %s6018_s13, %s5975_s17  ;;  %s4363_s12 = scalar_lea.hbm %s6018_s13, 16384 }
  0xc2   : > { %s4358_s0 = scalar_lea.hbm %s4941_s29, 4096  ;;  %p4364_p0 = scmp.lt.u32.totalorder %s4941_s29, %s6018_s13 }
  0xc3   : > { %p4359_p2 = scmp.ne.s32.totalorder %s4941_s29, %s4358_s0  ;;  %p4365_p5 = scmp.lt.u32.totalorder %s4363_s12, %s4358_s0 }
  0xc4   : > { %p4367_p4 = scmp.lt.u32.totalorder %s4358_s0, %s4941_s29 }
  0xc5   : > { %p4361_p10 = pnand %p4359_p2, %p6019_p13  ;;  %p4366_p3 = por %p4365_p5, %p4364_p0 }
  0xc7   : > { %p4362_p12 = pneg %p4361_p10  ;;  %p4368_p6 = por %p4367_p4, %p4366_p3 }
  0xc9   : > { %p4369_p8 = pnand %p4368_p6, %p4362_p12 }
  0xcb   : > { %4372 = shalt.err (!%p4369_p8)
}
  0xcc   : > { %s4373_s28 = scalar_lea.vmem %s4943_s7, 4096  ;;  %s4595_s1 = smov [#allocation16]  }
  0xcd   : > { %p4374_p1 = scmp.ne.s32.totalorder %s4943_s7, %s4373_s28  ;;  %s4378_s22 = sshll.u32 %s4595_s1, 4  ;;  %s4379_s22 = int_to_ptr.vmem [resolvable:$false] %s4378_s22 }
  0xce   : > { %s4380_s3 = scalar_lea.vmem %s4379_s22, 8192  ;;  %p4381_p10 = scmp.lt.s32.totalorder %s4943_s7, %s4379_s22 }
  0xcf   : > { %p4376_p7 = pnand %p4374_p1, %p6019_p13  ;;  %p4382_p11 = scmp.lt.s32.totalorder %s4380_s3, %s4373_s28 }
  0xd1   : > { %p4377_p2 = pneg %p4376_p7  ;;  %p4383_p0 = por %p4382_p11, %p4381_p10 }
  0xd3   : > { %p4384_p5 = pnand %p4383_p0, %p4377_p2 }
  0xd5   : > { %4387 = shalt.err (!%p4384_p5)
}
  0xd6   : > { %s4596_s0 = smov 256   ;;  %s4597_s6 = smov 16  }
  0xd7   : > { %p6020_p12 = scmp.ne.s32.totalorder %s6007_s18, 0  ;;  %s4598_s12 = smov [#allocation8]  }
  0xd8   : > { %s557_s9 = sshll.u32 %s4598_s12, 4  ;;  %s4599_s10 = smov [#allocation11]   ;;  %s558_s9 = int_to_ptr.vmem [resolvable:$true] %s557_s9 }
  0xd9   : > { %3978 = dma.hbm_to_vmem [thread:$0]  (!%p6020_p12), %s4941_s29, 4096, %s4943_s7, %s4823_s27, %s4596_s0, %s4596_s0, %s4597_s6  }
  0xda   : > { %s583_s1 = sshll.u32 %s4599_s10, 4  ;;  %s6021_s3 = sld [smem:[#allocation31_spill]]  ;;  %s4967_s1 = int_to_ptr.vmem [resolvable:$true] %s583_s1 }
  0xe0   : > { %s4388_s8 = scalar_lea.hbm %s6021_s3, 256 }
  0xe1   : > { %p4389_p11 = scmp.ne.s32.totalorder %s6021_s3, %s4388_s8  ;;  %p4395_p6 = scmp.lt.u32.totalorder %s4388_s8, %s6021_s3 }
  0xe3   : > { %p4391_p3 = pnand %p4389_p11, %p6012_p9 }
  0xe5   : > { %p4392_p4 = pneg %p4391_p3 }
  0xe7   : > { %p4397_p8 = pnand %p4395_p6, %p4392_p4 }
  0xe9   : > { %4400 = shalt.err (!%p4397_p8)
}
  0xea   : > { %s4401_s29 = scalar_lea.vmem %s558_s9, 256  ;;  %p4409_p10 = scmp.lt.s32.totalorder %s558_s9, %s558_s9 }
  0xeb   : > { %p4402_p1 = scmp.ne.s32.totalorder %s558_s9, %s4401_s29  ;;  %p4410_p0 = scmp.lt.s32.totalorder %s4401_s29, %s4401_s29 }
  0xed   : > { %p4404_p7 = pnand %p4402_p1, %p6012_p9  ;;  %p4411_p5 = por %p4410_p0, %p4409_p10 }
  0xef   : > { %p4405_p2 = pneg %p4404_p7 }
  0xf1   : > { %p4412_p12 = pnand %p4411_p5, %p4405_p2 }
  0xf3   : > { %4415 = shalt.err (!%p4412_p12)
}
  0xf4   : > { %p6022_p11 = scmp.ne.s32.totalorder %s5999_s24, 0  ;;  %s6023_s4 = sld [smem:[#allocation33_spill]] }
  0xf6   : > { %3959 = dma.hbm_to_vmem [thread:$0]  (!%p6022_p11), %s6021_s3, 256, %s558_s9, [#allocation7], %s6015_s26, %s6015_s26, %s6014_s16  }
  0xfa   : > { %s4416_s0 = scalar_lea.hbm %s6023_s4, 1024 }
  0xfb   : > { %p4417_p3 = scmp.ne.s32.totalorder %s6023_s4, %s4416_s0  ;;  %p4423_p6 = scmp.lt.u32.totalorder %s4416_s0, %s6023_s4 }
  0xfd   : > { %p4419_p12 = pnand %p4417_p3, %p6012_p9 }
  0xff   : > { %p4420_p4 = pneg %p4419_p12 }
 0x101   : > { %p4425_p8 = pnand %p4423_p6, %p4420_p4 }
 0x103   : > { %4428 = shalt.err (!%p4425_p8)
}
 0x104   : > { %s4429_s16 = scalar_lea.vmem %s4967_s1, 1024  ;;  %p4437_p10 = scmp.lt.s32.totalorder %s4967_s1, %s4967_s1 }
 0x105   : > { %p4430_p1 = scmp.ne.s32.totalorder %s4967_s1, %s4429_s16  ;;  %p4438_p0 = scmp.lt.s32.totalorder %s4429_s16, %s4429_s16 }
 0x107   : > { %p4432_p7 = pnand %p4430_p1, %p6012_p9  ;;  %p4439_p5 = por %p4438_p0, %p4437_p10 }
 0x109   : > { %p4433_p2 = pneg %p4432_p7 }
 0x10b   : > { %p4440_p3 = pnand %p4439_p5, %p4433_p2 }
 0x10d   : > { %4443 = shalt.err (!%p4440_p3)
}
 0x10e   : > { %s6024_s26 = smov 4   ;;  %s6025_s9 = smov 64  }
 0x10f   : > { %3965 = dma.hbm_to_vmem [thread:$0]  (!%p6022_p11), %s6023_s4, 1024, %s4967_s1, [#allocation10], %s6025_s9, %s6025_s9, %s6024_s26  }
 0x110   : > { %s4600_s29 = smov [#allocation12]   ;;  %s6026_s11 = sshll.u32 %s4582_s21, 12 }
 0x111   : > { %s596_s13 = sshll.u32 %s4600_s29, 4  ;;  %s5021_s0 = scalar_lea.hbm %s5938_s15, %s6026_s11  ;;  %s597_s13 = int_to_ptr.vmem [resolvable:$true] %s596_s13 }
 0x112   : > { %s6027_s6 = sshll.u32 %s4808_s14, 8  ;;  %s4444_s22 = scalar_lea.hbm %s5928_s5, 1024 }
 0x113   : > { %s712_s12 = scalar_lea.vmem [#allocation17], %s6027_s6  ;;  %p4445_p12 = scmp.ne.s32.totalorder %s5928_s5, %s4444_s22 }
 0x114   : > { %s719_s10 = sshll.u32 %s712_s12, 4  ;;  %p4451_p8 = scmp.lt.u32.totalorder %s4444_s22, %s5928_s5  ;;  %s5046_s10 = int_to_ptr.vmem [resolvable:$true] %s719_s10 }
 0x115   : > { %p4447_p4 = pnand %p4445_p12, %p6012_p9 }
 0x117   : > { %p4448_p6 = pneg %p4447_p4 }
 0x119   : > { %p4453_p1 = pnand %p4451_p8, %p4448_p6 }
 0x11b   : > { %4456 = shalt.err (!%p4453_p1)
}
 0x11c   : > { %s4457_s14 = scalar_lea.vmem %s597_s13, 1024  ;;  %p4465_p0 = scmp.lt.s32.totalorder %s597_s13, %s597_s13 }
 0x11d   : > { %p4458_p7 = scmp.ne.s32.totalorder %s597_s13, %s4457_s14  ;;  %p4466_p5 = scmp.lt.s32.totalorder %s4457_s14, %s4457_s14 }
 0x11f   : > { %p4460_p2 = pnand %p4458_p7, %p6012_p9  ;;  %p4467_p3 = por %p4466_p5, %p4465_p0 }
 0x121   : > { %p4461_p10 = pneg %p4460_p2 }
 0x123   : > { %p4468_p13 = pnand %p4467_p3, %p4461_p10 }
 0x125   : > { %4471 = shalt.err (!%p4468_p13)
}
 0x126   : > { %3968 = dma.hbm_to_vmem [thread:$0]  (!%p6022_p11), %s5928_s5, 1024, %s597_s13, [#allocation13], %s6025_s9, %s6025_s9, %s6024_s26  }
 0x127   : > { %s4472_s19 = scalar_lea.hbm %s5021_s0, 4096  ;;  %p6028_p12 = scmp.ne.s32.totalorder %s6009_s20, 0 }
 0x128   : > { %p4473_p9 = scmp.ne.s32.totalorder %s5021_s0, %s4472_s19  ;;  %s4477_s8 = scalar_lea.hbm %s5938_s15, 16384 }
 0x129   : > { %p4478_p6 = scmp.lt.u32.totalorder %s5021_s0, %s5938_s15  ;;  %p4479_p8 = scmp.lt.u32.totalorder %s4477_s8, %s4472_s19 }
 0x12a   : > { %p4475_p13 = pnand %p4473_p9, %p6028_p12  ;;  %p4481_p7 = scmp.lt.u32.totalorder %s4472_s19, %s5021_s0 }
 0x12b   : > { %p4480_p1 = por %p4479_p8, %p4478_p6 }
 0x12c   : > { %p4476_p4 = pneg %p4475_p13 }
 0x12d   : > { %p4482_p2 = por %p4481_p7, %p4480_p1 }
 0x12f   : > { %p4483_p11 = pnand %p4482_p2, %p4476_p4 }
 0x131   : > { %4486 = shalt.err (!%p4483_p11)
}
 0x132   : > { %s4487_s13 = scalar_lea.vmem %s5046_s10, 4096  ;;  %s4601_s12 = smov [#allocation17]  }
 0x133   : > { %p4488_p10 = scmp.ne.s32.totalorder %s5046_s10, %s4487_s13  ;;  %s4492_s28 = sshll.u32 %s4601_s12, 4  ;;  %s4493_s28 = int_to_ptr.vmem [resolvable:$false] %s4492_s28 }
 0x134   : > { %s4494_s16 = scalar_lea.vmem %s4493_s28, 8192  ;;  %p4495_p3 = scmp.lt.s32.totalorder %s5046_s10, %s4493_s28 }
 0x135   : > { %p4490_p0 = pnand %p4488_p10, %p6028_p12  ;;  %p4496_p9 = scmp.lt.s32.totalorder %s4494_s16, %s4487_s13 }
 0x137   : > { %p4491_p5 = pneg %p4490_p0  ;;  %p4497_p13 = por %p4496_p9, %p4495_p3 }
 0x139   : > { %p4498_p6 = pnand %p4497_p13, %p4491_p5 }
 0x13b   : > { %4501 = shalt.err (!%p4498_p6)
}
 0x13c   : > { %p6029_p4 = scmp.ne.s32.totalorder %s6007_s18, 0  ;;  %p6030_p12 = scmp.ne.s32.totalorder %s5998_s23, 0 }
 0x13d   : > { %p6031_p8 = scmp.eq.s32.totalorder (!%p6030_p12), %s4740_s2, 0 }
 0x13e   : > { %3981 = dma.hbm_to_vmem [thread:$0]  (!%p6029_p4), %s5021_s0, 4096, %s5046_s10, %s4823_s27, %s6025_s9, %s6025_s9, %s6024_s26  }
 0x13f   : > { %749 = sbr.rel (%p6030_p12) target bundleno = 3447 (0xd77), region = 96 }
 0x146   : > { %4545 = dma.done.wait (%p6031_p8), [#allocation4], 256   ;;  %p6032_p1 = pmov %p6031_p8 }
 0x148   : > { %4547 = vsyncadd (%p6032_p1), [#allocation4], 4294967040  ;;  %p6033_p7 = pmov %p6032_p1 }
 0x149   : > { %p6034_p2 = pmov %p6032_p1 }
 0x14a   : > { %4549 = dma.done.wait (%p6033_p7), [#allocation7], 512  }
 0x14b   : > { %4551 = vsyncadd (%p6034_p2), [#allocation7], 4294966784  ;;  %p6035_p11 = pmov %p6032_p1 }
 0x14c   : > { %p6036_p10 = pmov %p6032_p1 }
 0x14d   : > { %4553 = dma.done.wait (%p6035_p11), [#allocation10], 3072  }
 0x14e   : > { %4555 = vsyncadd (%p6036_p10), [#allocation10], 4294964224  ;;  %p6037_p0 = pmov %p6032_p1 }
 0x150   : > { %4557 = dma.done.wait (%p6037_p0), [#allocation13], 1024   ;;  %p6038_p5 = pmov %p6037_p0 }
 0x151   : > { %s6039_s20 = sld [smem:[#allocation28_spill]]  ;;  %s775_s23 = sand.u32 1, %s4740_s2  }
 0x152   : > { %4559 = vsyncadd (%p6038_p5), [#allocation13], 4294966272  ;;  %s777_s27 = sand.u32 1, %s4574_s30   ;;  %s776_s26 = scalar_lea.sflag [#allocation4], %s775_s23 }
 0x153   : > { %s3912_s18 = smul.u32 192, %s777_s27 }
 0x155   : > { %s5093_s9 = scalar_lea.vmem [#allocation14], %s3912_s18 }
 0x157   : > { %p6040_p3 = scmp.ne.s32.totalorder %s6039_s20, 0 }
 0x159   : > { %4561 = dma.done.wait (%p6040_p3), %s776_s26, 12288  }
 0x15a   : > { %4563 = vsyncadd (%p6040_p3), %s776_s26, 4294955008  ;;  %s3363_s0 = sshll.u32 %s777_s27, 6  ;;  %s3364_s10 = sshll.u32 %s777_s27, 8 }
 0x15b   : > { %p897_p9 = scmp.lt.s32.totalorder %s4740_s2, 3  ;;  %s6041_s14 = sld [smem:[#allocation38_spill]] }
 0x15c   : > { %s6044_s16 = sld [smem:[#allocation36_spill]]  ;;  %s6045_s26 = sld [smem:[#allocation42_spill]] }
 0x15d   : > { %s5101_s22 = scalar_select %p897_p9, %s4740_s2, 3 }
 0x15e   : > { %s6047_s11 = sld [smem:[#allocation44_spill]]  ;;  %s6048_s13 = sld [smem:[#allocation45_spill]] }
 0x15f   : > { %s3913_s7 = smul.u32 3, %s5101_s22  ;;  %s3366_s23 = sshll.u32 %s5101_s22, 2 }
 0x160   : > { %s5141_s28 = scalar_lea.vmem [#allocation16], %s3364_s10  ;;  %p6049_p13 = scmp.ne.s32.totalorder %s4740_s2, 0 }
 0x161   : > { %s903_s3 = scalar_lea.vmem %s6041_s14, %s5101_s22  ;;  %s6046_s14 = sld [smem:[#allocation43_spill]]  ;;  %v4060_v0 = vld [vmem:[#allocation11] sm:$0xff] (!%p6049_p13)   ;;  %v4602_v1 = vmov (!%p6049_p13), 0.0   ;;  %v4061_v2 = vld [vmem:[#allocation11 + $0x8] sm:$0xff] (!%p6049_p13)   ;;  %vm4603_vm0 = vmmov (!%p6049_p13), 0   ;;  %v4062_v3 = vld [vmem:[#allocation11 + $0x10] sm:$0xff] (!%p6049_p13)  }
 0x162   : > { %s5119_s20 = scalar_lea.vmem %s6044_s16, %s3913_s7  ;;  %s5125_s4 = scalar_lea.vmem %s6045_s26, %s3366_s23  ;;  %3629 = vmatprep.subr.bf16.mxu0 (!%p6049_p13), %v4602_v1  ;;  %3645 = vmatprep.mubr.msk.bf16.mxu0 (!%p6049_p13), %vm4603_vm0, %v4602_v1  ;;  %v4063_v4 = vld [vmem:[#allocation11 + $0x18] sm:$0xff] (!%p6049_p13)   ;;  %v4064_v5 = vld [vmem:[#allocation11 + $0x20] sm:$0xff] (!%p6049_p13)   ;;  %v4065_v6 = vld [vmem:[#allocation11 + $0x28] sm:$0xff] (!%p6049_p13)  }
 0x163   : > { %s5139_s7 = scalar_lea.vmem [#allocation15], %s3363_s0  ;;  %s5143_s16 = scalar_lea.vmem [#allocation17], %s3364_s10  ;;  %3630 = vmatpush3.bf16.msra.mxu0 (!%p6049_p13), %v4060_v0  ;;  %v4066_v7 = vld [vmem:[#allocation11 + $0x30] sm:$0xff] (!%p6049_p13)   ;;  %v4067_v8 = vld [vmem:[#allocation11 + $0x38] sm:$0xff] (!%p6049_p13)   ;;  %v947_v12 = vld [vmem:[#allocation6] sm:$0xff] (!%p6049_p13) }
 0x164   : > { %s919_s8 = scalar_lea.vmem %s6047_s11, %s5101_s22  ;;  %s922_s12 = scalar_lea.vmem %s6048_s13, %s5101_s22  ;;  %3631 = vmatprep.subr.bf16.mxu0 (!%p6049_p13), %v4602_v1  ;;  %v928_v9 = vld [vmem:[#allocation3] sm:$0xff] (!%p6049_p13)  ;;  %v929_v10 = vld [vmem:[#allocation3 + $0x8] sm:$0xff] (!%p6049_p13)  ;;  %v948_v14 = vld [vmem:[#allocation6 + $0x8] sm:$0xff] (!%p6049_p13) }
 0x165   : > { %927 = sbr.rel (%p6049_p13) target bundleno = 603 (0x25b), region = 140  ;;  %v930_v11 = vpack.c.bf16 (!%p6049_p13), %v929_v10, %v928_v9 }
 0x167   : > { %s916_s29 = scalar_lea.vmem %s6046_s14, %s5101_s22  ;;  %3632 = vmatpush3.bf16.msra.mxu0 (!%p6049_p13), %v4061_v2 }
 0x168   : > { %3633 = vmatprep.subr.bf16.mxu0 (!%p6049_p13), %v4602_v1 }
 0x16b   : > { %3634 = vmatpush3.bf16.msra.mxu0 (!%p6049_p13), %v4062_v3 }
 0x16c   : > { %3635 = vmatprep.subr.bf16.mxu0 %v4602_v1 }
 0x16f   : > { %3636 = vmatpush3.bf16.msra.mxu0 %v4063_v4 }
 0x170   : > { %3637 = vmatprep.subr.bf16.mxu0 %v4602_v1 }
 0x173   : > { %3638 = vmatpush3.bf16.msra.mxu0 %v4064_v5 }
 0x174   : > { %3639 = vmatprep.subr.bf16.mxu0 %v4602_v1 }
 0x177   : > { %3640 = vmatpush3.bf16.msra.mxu0 %v4065_v6 }
 0x178   : > { %3641 = vmatprep.subr.bf16.mxu0 %v4602_v1 }
 0x17b   : > { %3642 = vmatpush3.bf16.msra.mxu0 %v4066_v7 }
 0x17c   : > { %3643 = vmatprep.subr.bf16.mxu0 %v4602_v1 }
 0x17f   : > { %3644 = vmatpush3.bf16.msra.mxu0 %v4067_v8 }
 0x182   : > { %3646 = vmatmul.mubr.bf16.vlgmr.msra.gmra.mrb[0].mxu0 %v930_v11 }
 0x255   : > { %v1031_v13 = vpop.f32.mrb[0].mxu0 }
 0x256   : > { %v1032_v15 = vadd.f32 %v1031_v13, %v947_v12  ;;  %v3647_v16 = vpop.f32.mrb[1].mxu0 }
 0x257   : > { %v1034_v17 = vpop.f32.mrb[2].mxu0 }
 0x258   : > { %1038 = vst [vmem:[#allocation2] sm:$0xff] %v1032_v15  ;;  %v1035_v18 = vadd.f32 %v1034_v17, %v948_v14  ;;  %v3648_v19 = vpop.f32.mrb[3].mxu0 }
 0x25a   : > { %1039 = vst [vmem:[#allocation2 + $0x8] sm:$0xff] %v1035_v18 }
 0x25b PF: > { %v4068_v20 = vld [vmem:[%s5093_s9 + $0x4] ss:$12 sps:$4 sm:$0xff]   ;;  %v4070_v21 = vld [vmem:[%s5093_s9] ss:$12 sps:$4 sm:$0xff]   ;;  %v4604_v22 = vmov 0   ;;  %v1093_v40 = vlaneseq  ;;  %s4605_s0 = smov 32  }
 0x25c   : > { %1268 = vmatprep.mubr.bf16.mxu0 %v4604_v22  ;;  %1236 = vmatprep.subr.bf16.mxu0 %v4068_v20  ;;  %v4071_v23 = vld [vmem:[%s5093_s9 + $0x1c] ss:$12 sps:$4 sm:$0xff]   ;;  %v4073_v24 = vld [vmem:[%s5093_s9 + $0x18] ss:$12 sps:$4 sm:$0xff]   ;;  %v4074_v25 = vld [vmem:[%s5093_s9 + $0x34] ss:$12 sps:$4 sm:$0xff]  }
 0x25d   : > { %1237 = vmatpush1.bf16.msra.mxu0 %v4070_v21  ;;  %v4076_v26 = vld [vmem:[%s5093_s9 + $0x30] ss:$12 sps:$4 sm:$0xff]   ;;  %v4077_v27 = vld [vmem:[%s5093_s9 + $0x4c] ss:$12 sps:$4 sm:$0xff]   ;;  %v4079_v28 = vld [vmem:[%s5093_s9 + $0x48] ss:$12 sps:$4 sm:$0xff]  }
 0x25e   : > { %1238 = vmatprep.subr.bf16.mxu0 %v4071_v23  ;;  %v4080_v29 = vld [vmem:[%s5093_s9 + $0x64] ss:$12 sps:$4 sm:$0xff]   ;;  %v4082_v30 = vld [vmem:[%s5093_s9 + $0x60] ss:$12 sps:$4 sm:$0xff]   ;;  %v4083_v31 = vld [vmem:[%s5093_s9 + $0x7c] ss:$12 sps:$4 sm:$0xff]  }
 0x25f   : > { %v4085_v32 = vld [vmem:[%s5093_s9 + $0x78] ss:$12 sps:$4 sm:$0xff]   ;;  %v4086_v33 = vld [vmem:[%s5093_s9 + $0x94] ss:$12 sps:$4 sm:$0xff]   ;;  %v4088_v34 = vld [vmem:[%s5093_s9 + $0x90] ss:$12 sps:$4 sm:$0xff]  }
 0x260   : > { %v4089_v35 = vld [vmem:[%s5093_s9 + $0xac] ss:$12 sps:$4 sm:$0xff]   ;;  %v4091_v36 = vld [vmem:[%s5093_s9 + $0xa8] ss:$12 sps:$4 sm:$0xff]   ;;  %v1040_v37 = vld [vmem:[#allocation2] sm:$0xff]  ;;  %v5167_v41 = vshrl.u32 %v1093_v40, 7 }
 0x261   : > { %1239 = vmatpush1.bf16.msra.mxu0 %v4073_v24  ;;  %v1041_v38 = vld [vmem:[#allocation2 + $0x8] sm:$0xff]  ;;  %v5171_v43 = vld [vmem:[%s5119_s20] sm:$0x7]  ;;  %s4606_s10 = smov 16   ;;  %s4607_s11 = smov 48   ;;  %vm1706_vm1 = vcmask 130048  }
 0x262   : > { %1240 = vmatprep.subr.bf16.mxu0 %v4074_v25  ;;  %v5164_v39 = vpack.c.bf16 %v1041_v38, %v1040_v37  ;;  %v1095_v42 = vsub.s32 0, %v5167_v41  ;;  %v1099_v44 = vsub.s32 1, %v5167_v41  ;;  %s4608_s13 = smov 64   ;;  %s4609_s20 = smov 96   ;;  %vm1723_vm2 = vcmask 261120   ;;  %v5398_v37 = vld [vmem:[#allocation9] sm:$0xff] }
 0x263   : > { %s4610_s23 = smov 80   ;;  %s4611_s27 = smov 112   ;;  %vm1740_vm3 = vcmask 392192   ;;  %vm1757_vm4 = vcmask 523264   ;;  %vm1774_vm5 = vcmask 654336   ;;  %vm1791_vm6 = vcmask 785408  }
 0x264   : > { %v1096_v45 = vrot.slane %v5171_v43, %v1095_v42  ;;  %v1100_v46 = vrot.slane %v5171_v43, %v1099_v44  ;;  %vm1808_vm7 = vcmask 916480   ;;  %vm4613_vm8 = vmmov 0   ;;  %s6051_s1 = sld [smem:[#allocation39_spill]]  ;;  %s6053_s17 = sld [smem:[#allocation40_spill]] }
 0x265   : > { %1241 = vmatpush1.bf16.msra.mxu0 %v4076_v26  ;;  %p3478_p6 = scmp.ne.s32.totalorder %s4740_s2, 3 }
 0x266   : > { %1242 = vmatprep.subr.bf16.mxu0 %v4077_v27  ;;  %vm4615_vm9 = vmmov (!%p3478_p6), 0  }
 0x269   : > { %1243 = vmatpush1.bf16.msra.mxu0 %v4079_v28 }
 0x26a   : > { %1244 = vmatprep.subr.bf16.mxu0 %v4080_v29  ;;  %s6052_s14 = scalar_lea.vmem %s6051_s1, %s5101_s22  ;;  %s6054_s6 = scalar_lea.vmem %s6053_s17, %s5101_s22 }
 0x26d   : > { %1245 = vmatpush1.bf16.msra.mxu0 %v4082_v30 }
 0x26e   : > { %1246 = vmatprep.subr.bf16.mxu0 %v4083_v31 }
 0x271   : > { %1247 = vmatpush1.bf16.msra.mxu0 %v4085_v32 }
 0x272   : > { %1248 = vmatprep.subr.bf16.mxu0 %v4086_v33 }
 0x275   : > { %1249 = vmatpush1.bf16.msra.mxu0 %v4088_v34 }
 0x276   : > { %1250 = vmatprep.subr.bf16.mxu0 %v4089_v35 }
 0x279   : > { %1251 = vmatpush1.bf16.msra.mxu0 %v4091_v36 }
 0x27c   : > { %1269 = vmatmul.mubr.bf16.vlgmr.msra.gmra.mrb[0].mxu0 %v5164_v39 }
 0x34f   : > { %v1270_v47 = vpop.f32.mrb[0].mxu0 }
 0x350   : > { %v1271_v48 = vadd.f32 %v1270_v47, %v1096_v45  ;;  %v1272_v49 = vpop.f32.mrb[1].mxu0 }
 0x351   : > { %v1274_v50 = vpop.f32.mrb[2].mxu0  ;;  %v1273_v51 = vadd.f32 %v1272_v49, %v1100_v46 }
 0x352   : > { %v1320_v52 = vmul.f32 0.25, %v1271_v48  ;;  %v5180_v53 = vadd.f32 %v1274_v50, %v1096_v45  ;;  %v1276_v54 = vpop.f32.mrb[3].mxu0  ;;  %v5402_v45 = vld [vmem:[#allocation9 + $0x8] sm:$0xff] }
 0x353   : > { %1322 = vxpose.xlu0.b32.start [1/2] (short) %v1273_v51, 128  ;;  %v1277_v55 = vadd.f32 %v1276_v54, %v1100_v46 }
 0x354   : > { %3701 = vmatprep.mubr.f32.mxu0 %v1320_v52 }
 0x357   : > { %1323 = vxpose.xlu0.b32.end [2/2] (short) %v1277_v55, 128 }
 0x3d3   : > { %v5182_v56 = vpop.trf.xlu0 }
 0x3d4   : > { %1418 = vrot.lane.b32.xlu0 %v5182_v56, %s4605_s0  ;;  %1370 = vrot.lane.b32.xlu1 %v5182_v56, %s4606_s10 }
 0x3d7   : > { %v5188_v57 = vpop.trf.xlu0 }
 0x3d8   : > { %1466 = vrot.lane.b32.xlu1 %v5182_v56, %s4607_s11 }
 0x3db   : > { %v5192_v58 = vpop.trf.xlu0 }
 0x3dc   : > { %1514 = vrot.lane.b32.xlu1 %v5182_v56, %s4608_s13  ;;  %1614 = vrot.lane.b32.xlu0 %v5192_v58, %s4609_s20 }
 0x3df   : > { %v5198_v59 = vpop.trf.xlu0 }
 0x3e0   : > { %1562 = vrot.lane.b32.xlu1 %v5182_v56, %s4610_s23  ;;  %1662 = vrot.lane.b32.xlu0 %v5192_v58, %s4611_s27 }
 0x3e3   : > { %v5204_v60 = vpop.trf.xlu0 }
 0x3e4   : > { %1610 = vrot.lane.b32.xlu1 %v5182_v56, %s4609_s20  ;;  %1474 = vrot.lane.b32.xlu0 %v5204_v60, %s4607_s11 }
 0x3e7   : > { %v5218_v61 = vpop.trf.xlu0 }
 0x3e8   : > { %1658 = vrot.lane.b32.xlu1 %v5182_v56, %s4611_s27  ;;  %1522 = vrot.lane.b32.xlu0 %v5204_v60, %s4608_s13 }
 0x3eb   : > { %v5228_v62 = vpop.trf.xlu0 }
 0x3ec   : > { %1372 = vrot.lane.b32.xlu1 %v5188_v57, %s4606_s10  ;;  %1570 = vrot.lane.b32.xlu0 %v5204_v60, %s4610_s23 }
 0x3ef   : > { %v5250_v63 = vpop.trf.xlu0 }
 0x3f0   : > { %1420 = vrot.lane.b32.xlu1 %v5188_v57, %s4605_s0  ;;  %1618 = vrot.lane.b32.xlu0 %v5204_v60, %s4609_s20 }
 0x3f3   : > { %v5260_v0 = vpop.trf.xlu0 }
 0x3f4   : > { %1468 = vrot.lane.b32.xlu1 %v5188_v57, %s4607_s11  ;;  %1666 = vrot.lane.b32.xlu0 %v5204_v60, %s4611_s27 }
 0x3f7   : > { %v5282_v1 = vpop.trf.xlu0 }
 0x3f8   : > { %1516 = vrot.lane.b32.xlu1 %v5188_v57, %s4608_s13  ;;  %1382 = vrot.lane.b32.xlu0 %v5228_v62, %s4606_s10 }
 0x3fb   : > { %v5292_v2 = vpop.trf.xlu0 }
 0x3fc   : > { %1564 = vrot.lane.b32.xlu1 %v5188_v57, %s4610_s23  ;;  %1430 = vrot.lane.b32.xlu0 %v5228_v62, %s4605_s0 }
 0x3ff   : > { %v5306_v3 = vpop.trf.xlu0 }
 0x400   : > { %1612 = vrot.lane.b32.xlu1 %v5188_v57, %s4609_s20  ;;  %1478 = vrot.lane.b32.xlu0 %v5228_v62, %s4607_s11 }
 0x403   : > { %v5312_v4 = vpop.trf.xlu0 }
 0x404   : > { %1660 = vrot.lane.b32.xlu1 %v5188_v57, %s4611_s27  ;;  %1526 = vrot.lane.b32.xlu0 %v5228_v62, %s4608_s13 }
 0x407   : > { %v5322_v5 = vpop.trf.xlu0 }
 0x408   : > { %1374 = vrot.lane.b32.xlu1 %v5192_v58, %s4606_s10  ;;  %1574 = vrot.lane.b32.xlu0 %v5228_v62, %s4610_s23 }
 0x40b   : > { %v5328_v8 = vpop.trf.xlu0 }
 0x40c   : > { %1422 = vrot.lane.b32.xlu1 %v5192_v58, %s4605_s0  ;;  %1622 = vrot.lane.b32.xlu0 %v5228_v62, %s4609_s20 }
 0x40f   : > { %v5338_v10 = vpop.trf.xlu0 }
 0x410   : > { %1470 = vrot.lane.b32.xlu1 %v5192_v58, %s4607_s11  ;;  %1670 = vrot.lane.b32.xlu0 %v5228_v62, %s4611_s27 }
 0x414   : > { %1518 = vrot.lane.b32.xlu1 %v5192_v58, %s4608_s13  ;;  %1386 = vrot.lane.b32.xlu0 %v5260_v0, %s4606_s10 }
 0x418   : > { %1566 = vrot.lane.b32.xlu1 %v5192_v58, %s4610_s23  ;;  %1434 = vrot.lane.b32.xlu0 %v5260_v0, %s4605_s0 }
 0x41c   : > { %1376 = vrot.lane.b32.xlu1 %v5198_v59, %s4606_s10  ;;  %1482 = vrot.lane.b32.xlu0 %v5260_v0, %s4607_s11 }
 0x420   : > { %1424 = vrot.lane.b32.xlu1 %v5198_v59, %s4605_s0  ;;  %1530 = vrot.lane.b32.xlu0 %v5260_v0, %s4608_s13 }
 0x424   : > { %1472 = vrot.lane.b32.xlu1 %v5198_v59, %s4607_s11  ;;  %1578 = vrot.lane.b32.xlu0 %v5260_v0, %s4610_s23 }
 0x428   : > { %1520 = vrot.lane.b32.xlu1 %v5198_v59, %s4608_s13  ;;  %1626 = vrot.lane.b32.xlu0 %v5260_v0, %s4609_s20 }
 0x42c   : > { %1568 = vrot.lane.b32.xlu1 %v5198_v59, %s4610_s23  ;;  %1674 = vrot.lane.b32.xlu0 %v5260_v0, %s4611_s27 }
 0x430   : > { %1616 = vrot.lane.b32.xlu1 %v5198_v59, %s4609_s20  ;;  %1390 = vrot.lane.b32.xlu0 %v5292_v2, %s4606_s10 }
 0x434   : > { %1664 = vrot.lane.b32.xlu1 %v5198_v59, %s4611_s27  ;;  %1438 = vrot.lane.b32.xlu0 %v5292_v2, %s4605_s0 }
 0x438   : > { %1378 = vrot.lane.b32.xlu1 %v5204_v60, %s4606_s10  ;;  %1486 = vrot.lane.b32.xlu0 %v5292_v2, %s4607_s11 }
 0x43c   : > { %1426 = vrot.lane.b32.xlu1 %v5204_v60, %s4605_s0  ;;  %1534 = vrot.lane.b32.xlu0 %v5292_v2, %s4608_s13 }
 0x440   : > { %1380 = vrot.lane.b32.xlu1 %v5218_v61, %s4606_s10  ;;  %1582 = vrot.lane.b32.xlu0 %v5292_v2, %s4610_s23 }
 0x444   : > { %1428 = vrot.lane.b32.xlu1 %v5218_v61, %s4605_s0  ;;  %1630 = vrot.lane.b32.xlu0 %v5292_v2, %s4609_s20 }
 0x446   : > { %v1371_v6 = vpop.permute.xlu1 %1370  ;;  %v1419_v13 = vpop.permute.xlu0 %1418 }
 0x447   : > { %v1707_v23 = vsel %vm1706_vm1, %v5182_v56, %v1371_v6 }
 0x448   : > { %1476 = vrot.lane.b32.xlu1 %v5218_v61, %s4607_s11  ;;  %1678 = vrot.lane.b32.xlu0 %v5292_v2, %s4611_s27  ;;  %v1724_v26 = vsel %vm1723_vm2, %v1707_v23, %v1419_v13 }
 0x44a   : > { %v1467_v7 = vpop.permute.xlu1 %1466 }
 0x44b   : > { %v1741_v27 = vsel %vm1740_vm3, %v1724_v26, %v1467_v7 }
 0x44c   : > { %1524 = vrot.lane.b32.xlu1 %v5218_v61, %s4608_s13  ;;  %1394 = vrot.lane.b32.xlu0 %v5312_v4, %s4606_s10 }
 0x44e   : > { %v1515_v9 = vpop.permute.xlu1 %1514  ;;  %v5348_v15 = vpop.permute.xlu0 %1614 }
 0x44f   : > { %v1758_v29 = vsel %vm1757_vm4, %v1741_v27, %v1515_v9 }
 0x450   : > { %1572 = vrot.lane.b32.xlu1 %v5218_v61, %s4610_s23  ;;  %1442 = vrot.lane.b32.xlu0 %v5312_v4, %s4605_s0 }
 0x452   : > { %v1563_v11 = vpop.permute.xlu1 %1562  ;;  %v5358_v17 = vpop.permute.xlu0 %1662 }
 0x453   : > { %v1775_v32 = vsel %vm1774_vm5, %v1758_v29, %v1563_v11 }
 0x454   : > { %1620 = vrot.lane.b32.xlu1 %v5218_v61, %s4609_s20  ;;  %1490 = vrot.lane.b32.xlu0 %v5312_v4, %s4607_s11 }
 0x456   : > { %v1611_v12 = vpop.permute.xlu1 %1610  ;;  %v5364_v20 = vpop.permute.xlu0 %1474 }
 0x457   : > { %v1792_v34 = vsel %vm1791_vm6, %v1775_v32, %v1611_v12 }
 0x458   : > { %1668 = vrot.lane.b32.xlu1 %v5218_v61, %s4611_s27  ;;  %1538 = vrot.lane.b32.xlu0 %v5312_v4, %s4608_s13 }
 0x45a   : > { %v1659_v14 = vpop.permute.xlu1 %1658  ;;  %v5376_v24 = vpop.permute.xlu0 %1522 }
 0x45b   : > { %v1809_v38 = vsel %vm1808_vm7, %v1792_v34, %v1659_v14 }
 0x45c   : > { %1384 = vrot.lane.b32.xlu1 %v5250_v63, %s4606_s10  ;;  %1586 = vrot.lane.b32.xlu0 %v5312_v4, %s4610_s23  ;;  %v1825_v49 = vmul.f32 %v1809_v38, %v5398_v37 }
 0x45e   : > { %v1373_v16 = vpop.permute.xlu1 %1372  ;;  %v5391_v35 = vpop.permute.xlu0 %1570 }
 0x45f   : > { %v1708_v28 = vsel %vm1706_vm1, %v5188_v57, %v1373_v16 }
 0x460   : > { %1432 = vrot.lane.b32.xlu1 %v5250_v63, %s4605_s0  ;;  %1634 = vrot.lane.b32.xlu0 %v5312_v4, %s4609_s20 }
 0x462   : > { %v1421_v18 = vpop.permute.xlu1 %1420  ;;  %v5412_v51 = vpop.permute.xlu0 %1618 }
 0x463   : > { %v1725_v30 = vsel %vm1723_vm2, %v1708_v28, %v1421_v18 }
 0x464   : > { %1480 = vrot.lane.b32.xlu1 %v5250_v63, %s4607_s11  ;;  %1682 = vrot.lane.b32.xlu0 %v5312_v4, %s4611_s27 }
 0x466   : > { %v1469_v19 = vpop.permute.xlu1 %1468  ;;  %v5418_v56 = vpop.permute.xlu0 %1666 }
 0x467   : > { %v1742_v33 = vsel %vm1740_vm3, %v1725_v30, %v1469_v19 }
 0x468   : > { %1528 = vrot.lane.b32.xlu1 %v5250_v63, %s4608_s13  ;;  %1398 = vrot.lane.b32.xlu0 %v5328_v8, %s4606_s10 }
 0x46a   : > { %v1517_v21 = vpop.permute.xlu1 %1516  ;;  %v5426_v6 = vpop.permute.xlu0 %1382 }
 0x46b   : > { %v1759_v36 = vsel %vm1757_vm4, %v1742_v33, %v1517_v21 }
 0x46c   : > { %1576 = vrot.lane.b32.xlu1 %v5250_v63, %s4610_s23  ;;  %1446 = vrot.lane.b32.xlu0 %v5328_v8, %s4605_s0 }
 0x46e   : > { %v1565_v25 = vpop.permute.xlu1 %1564  ;;  %v5430_v11 = vpop.permute.xlu0 %1430 }
 0x46f   : > { %v1776_v40 = vsel %vm1774_vm5, %v1759_v36, %v1565_v25 }
 0x470   : > { %1624 = vrot.lane.b32.xlu1 %v5250_v63, %s4609_s20  ;;  %1494 = vrot.lane.b32.xlu0 %v5328_v8, %s4607_s11 }
 0x472   : > { %v1613_v31 = vpop.permute.xlu1 %1612  ;;  %v5436_v13 = vpop.permute.xlu0 %1478 }
 0x473   : > { %v1793_v46 = vsel %vm1791_vm6, %v1776_v40, %v1613_v31  ;;  %v5470_v40 = vld [vmem:[#allocation9 + $0x18] sm:$0xff] }
 0x474   : > { %1672 = vrot.lane.b32.xlu1 %v5250_v63, %s4611_s27  ;;  %1542 = vrot.lane.b32.xlu0 %v5328_v8, %s4608_s13 }
 0x476   : > { %v1661_v47 = vpop.permute.xlu1 %1660  ;;  %v5440_v18 = vpop.permute.xlu0 %1526 }
 0x477   : > { %v1810_v48 = vsel %vm1808_vm7, %v1793_v46, %v1661_v47 }
 0x478   : > { %v1826_v50 = vmul.f32 %v1810_v48, %v5402_v45  ;;  %1388 = vrot.lane.b32.xlu1 %v5282_v1, %s4606_s10  ;;  %1590 = vrot.lane.b32.xlu0 %v5328_v8, %s4610_s23 }
 0x47a   : > { %v1375_v52 = vpop.permute.xlu1 %1374  ;;  %v3814_v54 = vpack.c.bf16 %v1826_v50, %v1825_v49  ;;  %v5450_v26 = vpop.permute.xlu0 %1574 }
 0x47b   : > { %v1709_v21 = vsel %vm1706_vm1, %v5192_v58, %v1375_v52 }
 0x47c   : > { %1436 = vrot.lane.b32.xlu1 %v5282_v1, %s4605_s0  ;;  %1638 = vrot.lane.b32.xlu0 %v5328_v8, %s4609_s20 }
 0x47d   : > { %3815 = vmatprep.subr.bf16.mxu0 %v3814_v54 }
 0x47e   : > { %3817 = vmatpush3.bf16.msra.mxu0 %v3814_v54  ;;  %v1423_v55 = vpop.permute.xlu1 %1422  ;;  %v5462_v34 = vpop.permute.xlu0 %1622 }
 0x47f   : > { %v1726_v23 = vsel %vm1723_vm2, %v1709_v21, %v1423_v55 }
 0x480   : > { %1484 = vrot.lane.b32.xlu1 %v5282_v1, %s4607_s11  ;;  %1686 = vrot.lane.b32.xlu0 %v5328_v8, %s4611_s27 }
 0x482   : > { %v1471_v57 = vpop.permute.xlu1 %1470  ;;  %v5480_v52 = vpop.permute.xlu0 %1670 }
 0x483   : > { %v1743_v25 = vsel %vm1740_vm3, %v1726_v23, %v1471_v57 }
 0x484   : > { %1532 = vrot.lane.b32.xlu1 %v5282_v1, %s4608_s13 }
 0x486   : > { %v1519_v7 = vpop.permute.xlu1 %1518  ;;  %v5484_v57 = vpop.permute.xlu0 %1386 }
 0x487   : > { %v1760_v27 = vsel %vm1757_vm4, %v1743_v25, %v1519_v7 }
 0x488   : > { %1580 = vrot.lane.b32.xlu1 %v5282_v1, %s4610_s23 }
 0x48a   : > { %v1567_v9 = vpop.permute.xlu1 %1566 }
 0x48b   : > { %v1777_v29 = vsel %vm1774_vm5, %v1760_v27, %v1567_v9  ;;  %v5490_v9 = vpop.permute.xlu0 %1434 }
 0x48c   : > { %1628 = vrot.lane.b32.xlu1 %v5282_v1, %s4609_s20  ;;  %v1794_v30 = vsel %vm1791_vm6, %v1777_v29, %v5348_v15  ;;  %v5472_v15 = vld [vmem:[#allocation9 + $0x10] sm:$0xff] }
 0x48d   : > { %v1811_v38 = vsel %vm1808_vm7, %v1794_v30, %v5358_v17 }
 0x48e   : > { %v1377_v12 = vpop.permute.xlu1 %1376  ;;  %v1827_v50 = vmul.f32 %v1811_v38, %v5472_v15 }
 0x48f   : > { %v1710_v58 = vsel %vm1706_vm1, %v5198_v59, %v1377_v12  ;;  %v5497_v21 = vpop.permute.xlu0 %1482 }
 0x490   : > { %1676 = vrot.lane.b32.xlu1 %v5282_v1, %s4611_s27 }
 0x492   : > { %v1425_v14 = vpop.permute.xlu1 %1424 }
 0x493   : > { %v1727_v31 = vsel %vm1723_vm2, %v1710_v58, %v1425_v14 }
 0x494   : > { %1392 = vrot.lane.b32.xlu1 %v5306_v3, %s4606_s10 }
 0x496   : > { %v1473_v16 = vpop.permute.xlu1 %1472 }
 0x497   : > { %v1744_v33 = vsel %vm1740_vm3, %v1727_v31, %v1473_v16 }
 0x498   : > { %1440 = vrot.lane.b32.xlu1 %v5306_v3, %s4605_s0 }
 0x49a   : > { %v1521_v19 = vpop.permute.xlu1 %1520 }
 0x49b   : > { %v1761_v36 = vsel %vm1757_vm4, %v1744_v33, %v1521_v19 }
 0x49c   : > { %1488 = vrot.lane.b32.xlu1 %v5306_v3, %s4607_s11 }
 0x49e   : > { %v1569_v28 = vpop.permute.xlu1 %1568 }
 0x49f   : > { %v1778_v59 = vsel %vm1774_vm5, %v1761_v36, %v1569_v28  ;;  %v5507_v28 = vpop.permute.xlu0 %1530  ;;  %v5525_v36 = vld [vmem:[#allocation9 + $0x28] sm:$0xff] }
 0x4a0   : > { %1536 = vrot.lane.b32.xlu1 %v5306_v3, %s4608_s13 }
 0x4a2   : > { %v1617_v32 = vpop.permute.xlu1 %1616 }
 0x4a3   : > { %v1795_v46 = vsel %vm1791_vm6, %v1778_v59, %v1617_v32  ;;  %v5519_v32 = vpop.permute.xlu0 %1578 }
 0x4a4   : > { %1584 = vrot.lane.b32.xlu1 %v5306_v3, %s4610_s23 }
 0x4a6   : > { %v1665_v47 = vpop.permute.xlu1 %1664 }
 0x4a7   : > { %v1812_v48 = vsel %vm1808_vm7, %v1795_v46, %v1665_v47 }
 0x4a8   : > { %v1828_v49 = vmul.f32 %v1812_v48, %v5470_v40  ;;  %1632 = vrot.lane.b32.xlu1 %v5306_v3, %s4609_s20 }
 0x4aa   : > { %v1379_v17 = vpop.permute.xlu1 %1378  ;;  %v3818_v54 = vpack.c.bf16 %v1828_v49, %v1827_v50  ;;  %v1627_v49 = vpop.permute.xlu0 %1626 }
 0x4ab   : > { %v1711_v14 = vsel %vm1706_vm1, %v5204_v60, %v1379_v17 }
 0x4ac   : > { %1680 = vrot.lane.b32.xlu1 %v5306_v3, %s4611_s27  ;;  %3819 = vmatprep.subr.bf16.mxu0 %v3818_v54 }
 0x4ad   : > { %3821 = vmatpush3.bf16.msra.mxu0 %v3818_v54 }
 0x4ae   : > { %v1427_v55 = vpop.permute.xlu1 %1426  ;;  %v1675_v54 = vpop.permute.xlu0 %1674 }
 0x4af   : > { %v1728_v16 = vsel %vm1723_vm2, %v1711_v14, %v1427_v55 }
 0x4b0   : > { %1396 = vrot.lane.b32.xlu1 %v5322_v5, %s4606_s10  ;;  %v1745_v23 = vsel %vm1740_vm3, %v1728_v16, %v5364_v20  ;;  %v1713_v16 = vsel %vm1706_vm1, %v5228_v62, %v5426_v6 }
 0x4b1   : > { %v1762_v27 = vsel %vm1757_vm4, %v1745_v23, %v5376_v24 }
 0x4b2   : > { %v1381_v7 = vpop.permute.xlu1 %1380  ;;  %v1779_v29 = vsel %vm1774_vm5, %v1762_v27, %v5391_v35 }
 0x4b3   : > { %v1712_v58 = vsel %vm1706_vm1, %v5218_v61, %v1381_v7  ;;  %v1796_v24 = vsel %vm1791_vm6, %v1779_v29, %v5412_v51  ;;  %v5527_v61 = vld [vmem:[#allocation9 + $0x20] sm:$0xff]  ;;  %v5543_v7 = vpop.permute.xlu0 %1390 }
 0x4b4   : > { %1444 = vrot.lane.b32.xlu1 %v5322_v5, %s4605_s0  ;;  %v1813_v38 = vsel %vm1808_vm7, %v1796_v24, %v5418_v56 }
 0x4b5   : > { %v1829_v48 = vmul.f32 %v1813_v38, %v5527_v61 }
 0x4b6   : > { %v1429_v12 = vpop.permute.xlu1 %1428 }
 0x4b7   : > { %v1729_v20 = vsel %vm1723_vm2, %v1712_v58, %v1429_v12  ;;  %v5552_v23 = vpop.permute.xlu0 %1438 }
 0x4b8   : > { %1492 = vrot.lane.b32.xlu1 %v5322_v5, %s4607_s11 }
 0x4ba   : > { %v1477_v19 = vpop.permute.xlu1 %1476 }
 0x4bb   : > { %v1746_v31 = vsel %vm1740_vm3, %v1729_v20, %v1477_v19  ;;  %v1730_v19 = vsel %vm1723_vm2, %v1713_v16, %v5430_v11 }
 0x4bc   : > { %1540 = vrot.lane.b32.xlu1 %v5322_v5, %s4608_s13 }
 0x4be   : > { %v1525_v25 = vpop.permute.xlu1 %1524 }
 0x4bf   : > { %v1763_v33 = vsel %vm1757_vm4, %v1746_v31, %v1525_v25  ;;  %v1747_v25 = vsel %vm1740_vm3, %v1730_v19, %v5436_v13 }
 0x4c0   : > { %1588 = vrot.lane.b32.xlu1 %v5322_v5, %s4610_s23 }
 0x4c2   : > { %v1573_v60 = vpop.permute.xlu1 %1572 }
 0x4c3   : > { %v1780_v35 = vsel %vm1774_vm5, %v1763_v33, %v1573_v60  ;;  %v1764_v60 = vsel %vm1757_vm4, %v1747_v25, %v5440_v18 }
 0x4c4   : > { %1636 = vrot.lane.b32.xlu1 %v5322_v5, %s4609_s20  ;;  %v1781_v6 = vsel %vm1774_vm5, %v1764_v60, %v5450_v26  ;;  %v1487_v26 = vpop.permute.xlu0 %1486 }
 0x4c5   : > { %v1798_v58 = vsel %vm1791_vm6, %v1781_v6, %v5462_v34 }
 0x4c6   : > { %v1621_v30 = vpop.permute.xlu1 %1620  ;;  %v1815_v13 = vsel %vm1808_vm7, %v1798_v58, %v5480_v52 }
 0x4c7   : > { %v1797_v51 = vsel %vm1791_vm6, %v1780_v35, %v1621_v30  ;;  %v5576_v30 = vld [vmem:[#allocation9 + $0x38] sm:$0xff] }
 0x4c8   : > { %1684 = vrot.lane.b32.xlu1 %v5322_v5, %s4611_s27 }
 0x4ca   : > { %v1669_v59 = vpop.permute.xlu1 %1668 }
 0x4cb   : > { %v1814_v46 = vsel %vm1808_vm7, %v1797_v51, %v1669_v59  ;;  %v1535_v59 = vpop.permute.xlu0 %1534 }
 0x4cc   : > { %v1830_v47 = vmul.f32 %v1814_v46, %v5525_v36  ;;  %1400 = vrot.lane.b32.xlu1 %v5338_v10, %s4606_s10 }
 0x4ce   : > { %v1385_v50 = vpop.permute.xlu1 %1384  ;;  %v3822_v17 = vpack.c.bf16 %v1830_v47, %v1829_v48 }
 0x4cf   : > { %v1714_v27 = vsel %vm1706_vm1, %v5250_v63, %v1385_v50  ;;  %v5571_v63 = vld [vmem:[#allocation9 + $0x30] sm:$0xff]  ;;  %v1583_v46 = vpop.permute.xlu0 %1582 }
 0x4d0   : > { %1448 = vrot.lane.b32.xlu1 %v5338_v10, %s4605_s0  ;;  %3823 = vmatprep.subr.bf16.mxu0 %v3822_v17  ;;  %v1831_v33 = vmul.f32 %v1815_v13, %v5571_v63 }
 0x4d1   : > { %3825 = vmatpush3.bf16.msra.mxu0 %v3822_v17 }
 0x4d2   : > { %v1433_v56 = vpop.permute.xlu1 %1432 }
 0x4d3   : > { %v1731_v29 = vsel %vm1723_vm2, %v1714_v27, %v1433_v56  ;;  %v1631_v50 = vpop.permute.xlu0 %1630  ;;  %v1715_v56 = vsel %vm1706_vm1, %v5260_v0, %v5484_v57 }
 0x4d4   : > { %1496 = vrot.lane.b32.xlu1 %v5338_v10, %s4607_s11 }
 0x4d6   : > { %v1481_v55 = vpop.permute.xlu1 %1480 }
 0x4d7   : > { %v1748_v11 = vsel %vm1740_vm3, %v1731_v29, %v1481_v55  ;;  %v1732_v55 = vsel %vm1723_vm2, %v1715_v56, %v5490_v9  ;;  %v1679_v19 = vpop.permute.xlu0 %1678 }
 0x4d8   : > { %1544 = vrot.lane.b32.xlu1 %v5338_v10, %s4608_s13 }
 0x4da   : > { %v1529_v12 = vpop.permute.xlu1 %1528 }
 0x4db   : > { %v1765_v20 = vsel %vm1757_vm4, %v1748_v11, %v1529_v12  ;;  %v1749_v12 = vsel %vm1740_vm3, %v1732_v55, %v5497_v21  ;;  %v5599_v21 = vld [vmem:[#allocation9 + $0x40] sm:$0xff]  ;;  %v1395_v58 = vpop.permute.xlu0 %1394 }
 0x4dc   : > { %1592 = vrot.lane.b32.xlu1 %v5338_v10, %s4610_s23  ;;  %v1766_v16 = vsel %vm1757_vm4, %v1749_v12, %v5507_v28  ;;  %v5603_v28 = vld [vmem:[#allocation9 + $0x48] sm:$0xff] }
 0x4dd   : > { %v1783_v60 = vsel %vm1774_vm5, %v1766_v16, %v5519_v32  ;;  %v5627_v16 = vld [vmem:[#allocation9 + $0x58] sm:$0xff] }
 0x4de   : > { %v1577_v14 = vpop.permute.xlu1 %1576  ;;  %v1800_v57 = vsel %vm1791_vm6, %v1783_v60, %v1627_v49 }
 0x4df   : > { %v1782_v18 = vsel %vm1774_vm5, %v1765_v20, %v1577_v14 }
 0x4e0   : > { %1640 = vrot.lane.b32.xlu1 %v5338_v10, %s4609_s20 }
 0x4e2   : > { %v1625_v62 = vpop.permute.xlu1 %1624 }
 0x4e3   : > { %v1799_v24 = vsel %vm1791_vm6, %v1782_v18, %v1625_v62  ;;  %v1443_v18 = vpop.permute.xlu0 %1442 }
 0x4e4   : > { %1688 = vrot.lane.b32.xlu1 %v5338_v10, %s4611_s27 }
 0x4e6   : > { %v1673_v31 = vpop.permute.xlu1 %1672 }
 0x4e7   : > { %v1816_v34 = vsel %vm1808_vm7, %v1799_v24, %v1673_v31  ;;  %v1491_v31 = vpop.permute.xlu0 %1490 }
 0x4e8   : > { %v1832_v35 = vmul.f32 %v1816_v34, %v5576_v30 }
 0x4ea   : > { %v1389_v38 = vpop.permute.xlu1 %1388  ;;  %v3826_v51 = vpack.c.bf16 %v1832_v35, %v1831_v33 }
 0x4eb   : > { %v1716_v14 = vsel %vm1706_vm1, %v5282_v1, %v1389_v38  ;;  %v1817_v1 = vsel %vm1808_vm7, %v1800_v57, %v1675_v54  ;;  %v1539_v33 = vpop.permute.xlu0 %1538  ;;  %v1717_v38 = vsel %vm1706_vm1, %v5292_v2, %v5543_v7 }
 0x4ec   : > { %3827 = vmatprep.subr.bf16.mxu0 %v3826_v51  ;;  %v1833_v32 = vmul.f32 %v1817_v1, %v5599_v21 }
 0x4ed   : > { %3829 = vmatpush3.bf16.msra.mxu0 %v3826_v51  ;;  %v1734_v51 = vsel %vm1723_vm2, %v1717_v38, %v5552_v23  ;;  %v5623_v23 = vld [vmem:[#allocation9 + $0x50] sm:$0xff] }
 0x4ee   : > { %v1437_v52 = vpop.permute.xlu1 %1436 }
 0x4ef   : > { %v1733_v25 = vsel %vm1723_vm2, %v1716_v14, %v1437_v52  ;;  %v1751_v52 = vsel %vm1740_vm3, %v1734_v51, %v1487_v26  ;;  %v1587_v2 = vpop.permute.xlu0 %1586 }
 0x4f2   : > { %v1485_v47 = vpop.permute.xlu1 %1484 }
 0x4f3   : > { %v1750_v0 = vsel %vm1740_vm3, %v1733_v25, %v1485_v47  ;;  %v1635_v60 = vpop.permute.xlu0 %1634 }
 0x4f6   : > { %v1533_v48 = vpop.permute.xlu1 %1532 }
 0x4f7   : > { %v1767_v9 = vsel %vm1757_vm4, %v1750_v0, %v1533_v48  ;;  %v1768_v48 = vsel %vm1757_vm4, %v1751_v52, %v1535_v59 }
 0x4f8   : > { %v1785_v55 = vsel %vm1774_vm5, %v1768_v48, %v1583_v46 }
 0x4f9   : > { %v1802_v14 = vsel %vm1791_vm6, %v1785_v55, %v1631_v50 }
 0x4fa   : > { %v1581_v17 = vpop.permute.xlu1 %1580  ;;  %v1819_v26 = vsel %vm1808_vm7, %v1802_v14, %v1679_v19  ;;  %v1683_v19 = vpop.permute.xlu0 %1682 }
 0x4fb   : > { %v1784_v29 = vsel %vm1774_vm5, %v1767_v9, %v1581_v17 }
 0x4fe   : > { %v1629_v27 = vpop.permute.xlu1 %1628 }
 0x4ff   : > { %v1801_v62 = vsel %vm1791_vm6, %v1784_v29, %v1629_v27  ;;  %v1835_v27 = vmul.f32 %v1819_v26, %v5623_v23  ;;  %v1399_v29 = vpop.permute.xlu0 %1398 }
 0x502   : > { %v1677_v6 = vpop.permute.xlu1 %1676 }
 0x503   : > { %v1818_v11 = vsel %vm1808_vm7, %v1801_v62, %v1677_v6 }
 0x504   : > { %v1834_v49 = vmul.f32 %v1818_v11, %v5603_v28  ;;  %v1719_v11 = vsel %vm1706_vm1, %v5312_v4, %v1395_v58  ;;  %v5645_v58 = vld [vmem:[#allocation9 + $0x60] sm:$0xff] }
 0x506   : > { %v1393_v20 = vpop.permute.xlu1 %1392  ;;  %v3830_v13 = vpack.c.bf16 %v1834_v49, %v1833_v32  ;;  %v1736_v32 = vsel %vm1723_vm2, %v1719_v11, %v1443_v18  ;;  %v1447_v49 = vpop.permute.xlu0 %1446 }
 0x507   : > { %v1718_v47 = vsel %vm1706_vm1, %v5306_v3, %v1393_v20  ;;  %v1753_v20 = vsel %vm1740_vm3, %v1736_v32, %v1491_v31  ;;  %v5671_v32 = vld [vmem:[#allocation9 + $0x78] sm:$0xff] }
 0x508   : > { %3831 = vmatprep.subr.bf16.mxu0 %v3830_v13 }
 0x509   : > { %3833 = vmatpush3.bf16.msra.mxu0 %v3830_v13 }
 0x50a   : > { %v1441_v54 = vpop.permute.xlu1 %1440 }
 0x50b   : > { %v1735_v17 = vsel %vm1723_vm2, %v1718_v47, %v1441_v54  ;;  %v1770_v54 = vsel %vm1757_vm4, %v1753_v20, %v1539_v33  ;;  %v1495_v33 = vpop.permute.xlu0 %1494 }
 0x50e   : > { %v1489_v24 = vpop.permute.xlu1 %1488 }
 0x50f   : > { %v1752_v12 = vsel %vm1740_vm3, %v1735_v17, %v1489_v24  ;;  %v1543_v14 = vpop.permute.xlu0 %1542 }
 0x512   : > { %v1537_v34 = vpop.permute.xlu1 %1536 }
 0x513   : > { %v1769_v7 = vsel %vm1757_vm4, %v1752_v12, %v1537_v34 }
 0x516   : > { %v1585_v35 = vpop.permute.xlu1 %1584 }
 0x517   : > { %v1786_v3 = vsel %vm1774_vm5, %v1769_v7, %v1585_v35  ;;  %v1787_v35 = vsel %vm1774_vm5, %v1770_v54, %v1587_v2  ;;  %v1591_v7 = vpop.permute.xlu0 %1590 }
 0x518   : > { %v1804_v51 = vsel %vm1791_vm6, %v1787_v35, %v1635_v60  ;;  %v1321_v35 = vmul.f32 0.25, %v5180_v53  ;;  %v4095_v53 = vld [vmem:[%s5093_s9 + $0x50] ss:$12 sps:$4 sm:$0xff]  }
 0x519   : > { %v1821_v18 = vsel %vm1808_vm7, %v1804_v51, %v1683_v19  ;;  %v4612_v51 = vmov 0.0  }
 0x51a   : > { %v1633_v56 = vpop.permute.xlu1 %1632  ;;  %v1837_v17 = vmul.f32 %v1821_v18, %v5645_v58  ;;  %3649 = vmatprep.subr.bf16.mxu1 %v4612_v51  ;;  %3665 = vmatprep.mubr.msk.bf16.mxu1 %vm4613_vm8, %v4612_v51  ;;  %v4094_v18 = vld [vmem:[%s5093_s9 + $0x38] ss:$12 sps:$4 sm:$0xff]  }
 0x51b   : > { %v1803_v59 = vsel %vm1791_vm6, %v1786_v3, %v1633_v56 }
 0x51e   : > { %v1681_v25 = vpop.permute.xlu1 %1680 }
 0x51f   : > { %v1820_v46 = vsel %vm1808_vm7, %v1803_v59, %v1681_v25  ;;  %v1639_v59 = vpop.permute.xlu0 %1638 }
 0x520   : > { %v1836_v50 = vmul.f32 %v1820_v46, %v5627_v16  ;;  %v1721_v46 = vsel %vm1706_vm1, %v5328_v8, %v1399_v29  ;;  %v5667_v29 = vld [vmem:[#allocation9 + $0x70] sm:$0xff] }
 0x522   : > { %v1397_v0 = vpop.permute.xlu1 %1396  ;;  %v3834_v57 = vpack.c.bf16 %v1836_v50, %v1835_v27  ;;  %v1738_v27 = vsel %vm1723_vm2, %v1721_v46, %v1447_v49  ;;  %v3874_v46 = vpack.c.bf16 %v5671_v32, %v5667_v29 }
 0x523   : > { %v1720_v13 = vsel %vm1706_vm1, %v5322_v5, %v1397_v0  ;;  %v5649_v5 = vld [vmem:[#allocation9 + $0x68] sm:$0xff]  ;;  %v1755_v50 = vsel %vm1740_vm3, %v1738_v27, %v1495_v33  ;;  %v1103_v27 = vsub.s32 2, %v5167_v41 }
 0x524   : > { %3835 = vmatprep.subr.bf16.mxu0 %v3834_v57  ;;  %v1772_v0 = vsel %vm1757_vm4, %v1755_v50, %v1543_v14  ;;  %v4097_v33 = vld [vmem:[%s5093_s9 + $0x80] ss:$12 sps:$4 sm:$0xff]   ;;  %v1841_v14 = vld [vmem:[#allocation8] sm:$0xff] }
 0x525   : > { %3837 = vmatpush3.bf16.msra.mxu0 %v3834_v57  ;;  %v1687_v57 = vpop.permute.xlu0 %1686  ;;  %v1104_v50 = vrot.slane %v5171_v43, %v1103_v27 }
 0x526   : > { %v1445_v9 = vpop.permute.xlu1 %1444 }
 0x527   : > { %v1737_v24 = vsel %vm1723_vm2, %v1720_v13, %v1445_v9 }
 0x52a   : > { %v1493_v1 = vpop.permute.xlu1 %1492 }
 0x52b   : > { %v1754_v38 = vsel %vm1740_vm3, %v1737_v24, %v1493_v1  ;;  %v1789_v1 = vsel %vm1774_vm5, %v1772_v0, %v1591_v7 }
 0x52e   : > { %v1541_v62 = vpop.permute.xlu1 %1540 }
 0x52f   : > { %v1771_v4 = vsel %vm1757_vm4, %v1754_v38, %v1541_v62  ;;  %v4092_v38 = vld [vmem:[%s5093_s9 + $0x8] ss:$12 sps:$4 sm:$0xff]  }
 0x530   : > { %3650 = vmatpush3.bf16.msra.mxu1 %v4092_v38 }
 0x531   : > { %3651 = vmatprep.subr.bf16.mxu1 %v4612_v51 }
 0x532   : > { %v1589_v6 = vpop.permute.xlu1 %1588 }
 0x533   : > { %v1788_v31 = vsel %vm1774_vm5, %v1771_v4, %v1589_v6  ;;  %v1806_v6 = vsel %vm1791_vm6, %v1789_v1, %v1639_v59  ;;  %v4093_v4 = vld [vmem:[%s5093_s9 + $0x20] ss:$12 sps:$4 sm:$0xff]   ;;  %v3866_v59 = vpack.c.bf16 %v5627_v16, %v5623_v23 }
 0x534   : > { %v1823_v11 = vsel %vm1808_vm7, %v1806_v6, %v1687_v57  ;;  %3652 = vmatpush3.bf16.msra.mxu1 %v4093_v4 }
 0x535   : > { %v1839_v54 = vmul.f32 %v1823_v11, %v5667_v29  ;;  %3653 = vmatprep.subr.bf16.mxu1 %v4612_v51 }
 0x536   : > { %v1637_v34 = vpop.permute.xlu1 %1636 }
 0x537   : > { %v1805_v52 = vsel %vm1791_vm6, %v1788_v31, %v1637_v34  ;;  %v4096_v31 = vld [vmem:[%s5093_s9 + $0x68] ss:$12 sps:$4 sm:$0xff]  }
 0x538   : > { %3654 = vmatpush3.bf16.msra.mxu1 %v4094_v18 }
 0x539   : > { %3655 = vmatprep.subr.bf16.mxu1 %v4612_v51 }
 0x53a   : > { %v1685_v47 = vpop.permute.xlu1 %1684 }
 0x53b   : > { %v1822_v48 = vsel %vm1808_vm7, %v1805_v52, %v1685_v47  ;;  %v4098_v52 = vld [vmem:[%s5093_s9 + $0x98] ss:$12 sps:$4 sm:$0xff]   ;;  %v4099_v47 = vld [vmem:[%s5093_s9 + $0xb0] ss:$12 sps:$4 sm:$0xff]  }
 0x53c   : > { %v1838_v56 = vmul.f32 %v1822_v48, %v5649_v5  ;;  %3656 = vmatpush3.bf16.msra.mxu1 %v4095_v53  ;;  %v3846_v48 = vpack.c.bf16 %v5402_v45, %v5398_v37  ;;  %v4100_v53 = vld [vmem:[%s5139_s7] sm:$0xff]  }
 0x53d   : > { %3657 = vmatprep.subr.bf16.mxu1 %v4612_v51 }
 0x53e   : > { %v1401_v55 = vpop.permute.xlu1 %1400  ;;  %v3838_v12 = vpack.c.bf16 %v1838_v56, %v1837_v17  ;;  %v3850_v17 = vpack.c.bf16 %v5470_v40, %v5472_v15  ;;  %v3854_v56 = vpack.c.bf16 %v5525_v36, %v5527_v61 }
 0x53f   : > { %v1722_v60 = vsel %vm1706_vm1, %v5338_v10, %v1401_v55  ;;  %v3858_v55 = vpack.c.bf16 %v5576_v30, %v5571_v63 }
 0x540   : > { %3839 = vmatprep.subr.bf16.mxu0 %v3838_v12  ;;  %3658 = vmatpush3.bf16.msra.mxu1 %v4096_v31  ;;  %v4101_v31 = vld [vmem:[%s5139_s7 + $0x8] sm:$0xff]  }
 0x541   : > { %3841 = vmatpush3.bf16.msra.mxu0 %v3838_v12  ;;  %3659 = vmatprep.subr.bf16.mxu1 %v4612_v51  ;;  %v1842_v12 = vld [vmem:[#allocation8 + $0x8] sm:$0xff] }
 0x542   : > { %v1449_v2 = vpop.permute.xlu1 %1448 }
 0x543   : > { %v1739_v9 = vsel %vm1723_vm2, %v1722_v60, %v1449_v2 }
 0x544   : > { %3660 = vmatpush3.bf16.msra.mxu1 %v4097_v33  ;;  %v4102_v33 = vld [vmem:[%s5139_s7 + $0x10] sm:$0xff]  }
 0x545   : > { %3661 = vmatprep.subr.bf16.mxu1 %v4612_v51 }
 0x546   : > { %v1497_v26 = vpop.permute.xlu1 %1496 }
 0x547   : > { %v1756_v62 = vsel %vm1740_vm3, %v1739_v9, %v1497_v26 }
 0x548   : > { %3662 = vmatpush3.bf16.msra.mxu1 %v4098_v52  ;;  %v4103_v52 = vld [vmem:[%s5139_s7 + $0x18] sm:$0xff]  }
 0x549   : > { %3663 = vmatprep.subr.bf16.mxu1 %v4612_v51 }
 0x54a   : > { %v1545_v3 = vpop.permute.xlu1 %1544 }
 0x54b   : > { %v1773_v8 = vsel %vm1757_vm4, %v1756_v62, %v1545_v3  ;;  %v3862_v3 = vpack.c.bf16 %v5603_v28, %v5599_v21 }
 0x54c   : > { %3664 = vmatpush3.bf16.msra.mxu1 %v4099_v47  ;;  %v4104_v47 = vld [vmem:[%s5139_s7 + $0x20] sm:$0xff]  }
 0x54d   : > { %3847 = vmatprep.subr.bf16.mxu1 %v3846_v48 }
 0x54e   : > { %v1593_v25 = vpop.permute.xlu1 %1592 }
 0x54f   : > { %v1790_v10 = vsel %vm1774_vm5, %v1773_v8, %v1593_v25  ;;  %3666 = vmatmul.mubr.bf16.vlgmr.msra.gmra.mrb[0].mxu1 %v5164_v39  ;;  %v3870_v25 = vpack.c.bf16 %v5649_v5, %v5645_v58 }
 0x550   : > { %3849 = vmatpush3.bf16.msra.mxu1 %v3846_v48  ;;  %v4105_v48 = vld [vmem:[%s5139_s7 + $0x28] sm:$0xff]  }
 0x551   : > { %3851 = vmatprep.subr.bf16.mxu1 %v3850_v17 }
 0x552   : > { %v1641_v19 = vpop.permute.xlu1 %1640 }
 0x553   : > { %v1807_v49 = vsel %vm1791_vm6, %v1790_v10, %v1641_v19 }
 0x554   : > { %3853 = vmatpush3.bf16.msra.mxu1 %v3850_v17  ;;  %v4106_v17 = vld [vmem:[%s5139_s7 + $0x30] sm:$0xff]  }
 0x555   : > { %3855 = vmatprep.subr.bf16.mxu1 %v3854_v56 }
 0x556   : > { %v1689_v20 = vpop.permute.xlu1 %1688 }
 0x557   : > { %v1824_v13 = vsel %vm1808_vm7, %v1807_v49, %v1689_v20 }
 0x558   : > { %v1840_v24 = vmul.f32 %v1824_v13, %v5671_v32  ;;  %3857 = vmatpush3.bf16.msra.mxu1 %v3854_v56 }
 0x559   : > { %3859 = vmatprep.subr.bf16.mxu1 %v3858_v55 }
 0x55a   : > { %v3842_v34 = vpack.c.bf16 %v1840_v24, %v1839_v54 }
 0x55c   : > { %3843 = vmatprep.subr.bf16.mxu0 %v3842_v34  ;;  %3861 = vmatpush3.bf16.msra.mxu1 %v3858_v55 }
 0x55d   : > { %3845 = vmatpush3.bf16.msra.mxu0 %v3842_v34  ;;  %3863 = vmatprep.subr.bf16.mxu1 %v3862_v3 }
 0x560   : > { %3702 = vmatmul.mubr.f32.vlgmr.msra.gmra.mrb[4].mxu0 %v1321_v35  ;;  %3865 = vmatpush3.bf16.msra.mxu1 %v3862_v3 }
 0x561   : > { %3867 = vmatprep.subr.bf16.mxu1 %v3866_v59 }
 0x564   : > { %3869 = vmatpush3.bf16.msra.mxu1 %v3866_v59 }
 0x565   : > { %3871 = vmatprep.subr.bf16.mxu1 %v3870_v25 }
 0x568   : > { %3873 = vmatpush3.bf16.msra.mxu1 %v3870_v25 }
 0x569   : > { %3875 = vmatprep.subr.bf16.mxu1 %v3874_v46 }
 0x56c   : > { %3877 = vmatpush3.bf16.msra.mxu1 %v3874_v46 }
 0x56d   : > { %3774 = vmatprep.subr.bf16.mxu1 %v4612_v51 }
 0x622   : > { %v1313_v60 = vpop.f32.mrb[0].mxu1 }
 0x623   : > { %v1314_v0 = vadd.f32 %v1313_v60, %v1104_v50  ;;  %v3667_v57 = vpop.f32.mrb[1].mxu1 }
 0x624   : > { %v1316_v9 = vpop.f32.mrb[2].mxu1 }
 0x625   : > { %v1317_v19 = vadd.f32 %v1316_v9, %v1104_v50  ;;  %v2007_v1 = vmul.f32 %v1314_v0, %v5398_v37  ;;  %v2009_v62 = vmul.f32 %v1314_v0, %v5472_v15  ;;  %v2011_v6 = vmul.f32 %v1314_v0, %v5527_v61  ;;  %v3668_v8 = vpop.f32.mrb[3].mxu1 }
 0x626   : > { %v2013_v11 = vmul.f32 %v1314_v0, %v5571_v63  ;;  %v2015_v10 = vmul.f32 %v1314_v0, %v5599_v21  ;;  %v2017_v49 = vmul.f32 %v1314_v0, %v5623_v23  ;;  %v2019_v43 = vmul.f32 %v1314_v0, %v5645_v58  ;;  %v4110_v8 = vld [vmem:[%s5141_s28 + $0x4] ss:$16 sps:$4 sm:$0xff]  }
 0x627   : > { %v2008_v20 = vmul.f32 %v1317_v19, %v5402_v45  ;;  %v2010_v13 = vmul.f32 %v1317_v19, %v5470_v40  ;;  %v2012_v54 = vmul.f32 %v1317_v19, %v5525_v36  ;;  %v2014_v37 = vmul.f32 %v1317_v19, %v5576_v30 }
 0x628   : > { %v2016_v15 = vmul.f32 %v1317_v19, %v5603_v28  ;;  %v2018_v61 = vmul.f32 %v1317_v19, %v5627_v16  ;;  %v2020_v63 = vmul.f32 %v1317_v19, %v5649_v5  ;;  %v2021_v21 = vmul.f32 %v1314_v0, %v5667_v29  ;;  %v4204_v0 = vld [vmem:[#allocation2] sm:$0xff] }
 0x629   : > { %v3878_v24 = vpack.c.bf16 %v2008_v20, %v2007_v1  ;;  %v3882_v23 = vpack.c.bf16 %v2010_v13, %v2009_v62  ;;  %v3886_v34 = vpack.c.bf16 %v2012_v54, %v2011_v6  ;;  %v3890_v58 = vpack.c.bf16 %v2014_v37, %v2013_v11  ;;  %v4205_v1 = vld [vmem:[#allocation2 + $0x8] sm:$0xff]  ;;  %v4114_v13 = vld [vmem:[%s5141_s28 + $0x20] ss:$16 sps:$4 sm:$0xff]   ;;  %v4122_v37 = vld [vmem:[%s5141_s28 + $0x44] ss:$16 sps:$4 sm:$0xff]  }
 0x62a   : > { %v3894_v35 = vpack.c.bf16 %v2016_v15, %v2015_v10  ;;  %v3898_v45 = vpack.c.bf16 %v2018_v61, %v2017_v49  ;;  %v3902_v38 = vpack.c.bf16 %v2020_v63, %v2019_v43  ;;  %v2022_v40 = vmul.f32 %v1317_v19, %v5671_v32  ;;  %v4113_v11 = vld [vmem:[%s5141_s28 + $0xc] ss:$16 sps:$4 sm:$0xff]   ;;  %v4108_v10 = vld [vmem:[%s5141_s28] ss:$16 sps:$4 sm:$0xff]   ;;  %v4111_v49 = vld [vmem:[%s5141_s28 + $0x8] ss:$16 sps:$4 sm:$0xff]  }
 0x62b   : > { %3879 = vmatprep.subr.bf16.mxu0 %v3878_v24  ;;  %v4116_v43 = vld [vmem:[%s5141_s28 + $0x24] ss:$16 sps:$4 sm:$0xff]   ;;  %v4119_v20 = vld [vmem:[%s5141_s28 + $0x2c] ss:$16 sps:$4 sm:$0xff]   ;;  %v4117_v54 = vld [vmem:[%s5141_s28 + $0x28] ss:$16 sps:$4 sm:$0xff]  }
 0x62c   : > { %3881 = vmatpush3.bf16.msra.mxu0 %v3878_v24  ;;  %v3906_v36 = vpack.c.bf16 %v2022_v40, %v2021_v21  ;;  %v4125_v15 = vld [vmem:[%s5141_s28 + $0x4c] ss:$16 sps:$4 sm:$0xff]   ;;  %v4120_v61 = vld [vmem:[%s5141_s28 + $0x40] ss:$16 sps:$4 sm:$0xff]   ;;  %v4123_v63 = vld [vmem:[%s5141_s28 + $0x48] ss:$16 sps:$4 sm:$0xff]  }
 0x62d   : > { %3883 = vmatprep.subr.bf16.mxu0 %v3882_v23  ;;  %v4128_v21 = vld [vmem:[%s5141_s28 + $0x64] ss:$16 sps:$4 sm:$0xff]   ;;  %v4131_v24 = vld [vmem:[%s5141_s28 + $0x6c] ss:$16 sps:$4 sm:$0xff]  }
 0x62e   : > { %v4140_v40 = vld [vmem:[%s5141_s28 + $0xa4] ss:$16 sps:$4 sm:$0xff]  }
 0x630   : > { %3885 = vmatpush3.bf16.msra.mxu0 %v3882_v23  ;;  %v4126_v23 = vld [vmem:[%s5141_s28 + $0x60] ss:$16 sps:$4 sm:$0xff]  }
 0x631   : > { %3887 = vmatprep.subr.bf16.mxu0 %v3886_v34 }
 0x633   : > { %v3703_v2 = vpop.f32.mrb[4].mxu0 }
 0x634   : > { %v5705_v7 = vadd.f32 %v3703_v2, %v1842_v12  ;;  %v1909_v26 = vpop.f32.mrb[5].mxu0  ;;  %3889 = vmatpush3.bf16.msra.mxu0 %v3886_v34  ;;  %v4129_v34 = vld [vmem:[%s5141_s28 + $0x68] ss:$16 sps:$4 sm:$0xff]  }
 0x635   : > { %v5707_v39 = vadd.f32 %v1909_v26, %v1841_v14  ;;  %3891 = vmatprep.subr.bf16.mxu0 %v3890_v58  ;;  %v4107_v26 = vld [vmem:[%s5139_s7 + $0x38] sm:$0xff]  }
 0x636   : > { %1920 = vmax.xlane.f32.xlu1 %v5705_v7 }
 0x637   : > { %1918 = vmax.xlane.f32.xlu0 %v5707_v39 }
 0x638   : > { %3893 = vmatpush3.bf16.msra.mxu0 %v3890_v58  ;;  %v4134_v58 = vld [vmem:[%s5141_s28 + $0x84] ss:$16 sps:$4 sm:$0xff]  }
 0x639   : > { %3895 = vmatprep.subr.bf16.mxu0 %v3894_v35 }
 0x63c   : > { %3897 = vmatpush3.bf16.msra.mxu0 %v3894_v35  ;;  %v4132_v35 = vld [vmem:[%s5141_s28 + $0x80] ss:$16 sps:$4 sm:$0xff]  }
 0x63d   : > { %3899 = vmatprep.subr.bf16.mxu0 %v3898_v45 }
 0x640   : > { %3901 = vmatpush3.bf16.msra.mxu0 %v3898_v45  ;;  %v4135_v45 = vld [vmem:[%s5141_s28 + $0x88] ss:$16 sps:$4 sm:$0xff]  }
 0x641   : > { %3903 = vmatprep.subr.bf16.mxu0 %v3902_v38 }
 0x644   : > { %3905 = vmatpush3.bf16.msra.mxu0 %v3902_v38  ;;  %v4137_v38 = vld [vmem:[%s5141_s28 + $0x8c] ss:$16 sps:$4 sm:$0xff]  }
 0x645   : > { %3907 = vmatprep.subr.bf16.mxu0 %v3906_v36 }
 0x648   : > { %3909 = vmatpush3.bf16.msra.mxu0 %v3906_v36  ;;  %v4143_v36 = vld [vmem:[%s5141_s28 + $0xac] ss:$16 sps:$4 sm:$0xff]  }
 0x649   : > { %2473 = vmatprep.subr.bf16.mxu0 %v4110_v8 }
 0x6c3   : > { %v1921_v30 = vpop.xlane.xlu1 %1920 }
 0x6c4   : > { %v1923_v28 = vsub.f32 %v5705_v7, %v1921_v30  ;;  %v1919_v16 = vpop.xlane.xlu0 %1918  ;;  %v4138_v30 = vld [vmem:[%s5141_s28 + $0xa0] ss:$16 sps:$4 sm:$0xff]  }
 0x6c5   : > { %v1922_v5 = vsub.f32 %v5707_v39, %v1919_v16  ;;  %v4146_v16 = vld [vmem:[%s5141_s28 + $0xc4] ss:$16 sps:$4 sm:$0xff]  }
 0x6c6   : > { %v1926_v29 = vmul.f32 1.442695, %v1923_v28  ;;  %v4141_v28 = vld [vmem:[%s5141_s28 + $0xa8] ss:$16 sps:$4 sm:$0xff]  }
 0x6c7   : > { %v1924_v32 = vmul.f32 1.442695, %v1922_v5  ;;  %v4149_v5 = vld [vmem:[%s5141_s28 + $0xcc] ss:$16 sps:$4 sm:$0xff]  }
 0x6c9   : > { %4188 = vpow2.f32 %v1924_v32  ;;  %v4147_v32 = vld [vmem:[%s5141_s28 + $0xc8] ss:$16 sps:$4 sm:$0xff]  }
 0x6ca   : > { %4190 = vpow2.f32 %v1926_v29  ;;  %v4144_v29 = vld [vmem:[%s5141_s28 + $0xc0] ss:$16 sps:$4 sm:$0xff]  }
 0x6d3   : > { %v4189_v4 = vpop.eup %4188 }
 0x6d4   : > { %v4191_v18 = vpop.eup %4190  ;;  %3736 = vmatprep.mubr.f32.mxu1 %v4189_v4 }
 0x6d5   : > { %3737 = vmatmul.mubr.f32.vlgmr.msra.gmra.mrb[4].mxu1 %v4191_v18 }
 0x6d6   : > { %3790 = vmatprep.mubr.msk.bf16.mxu1 %vm4613_vm8, %v4612_v51  ;;  %3775 = vmatpush3.bf16.msra.mxu1 %v4100_v53  ;;  %v4150_v53 = vld [vmem:[%s5141_s28 + $0xe0] ss:$16 sps:$4 sm:$0xff]  }
 0x6d7   : > { %3776 = vmatprep.subr.bf16.mxu1 %v4612_v51 }
 0x6da   : > { %3777 = vmatpush3.bf16.msra.mxu1 %v4101_v31  ;;  %v4153_v31 = vld [vmem:[%s5141_s28 + $0xe8] ss:$16 sps:$4 sm:$0xff]  }
 0x6db   : > { %3778 = vmatprep.subr.bf16.mxu1 %v4612_v51 }
 0x6de   : > { %3779 = vmatpush3.bf16.msra.mxu1 %v4102_v33  ;;  %v4156_v33 = vld [vmem:[%s5143_s16 + $0x40] sm:$0xff]  }
 0x6df   : > { %3780 = vmatprep.subr.bf16.mxu1 %v4612_v51 }
 0x6e2   : > { %3781 = vmatpush3.bf16.msra.mxu1 %v4103_v52  ;;  %v4157_v52 = vld [vmem:[%s5143_s16 + $0xc0] sm:$0xff]  }
 0x6e3   : > { %3782 = vmatprep.subr.bf16.mxu1 %v4612_v51 }
 0x6e6   : > { %3783 = vmatpush3.bf16.msra.mxu1 %v4104_v47 }
 0x6e7   : > { %3784 = vmatprep.subr.bf16.mxu1 %v4612_v51 }
 0x6ea   : > { %3785 = vmatpush3.bf16.msra.mxu1 %v4105_v48 }
 0x6eb   : > { %3786 = vmatprep.subr.bf16.mxu1 %v4612_v51 }
 0x6ee   : > { %3787 = vmatpush3.bf16.msra.mxu1 %v4106_v17 }
 0x6ef   : > { %3788 = vmatprep.subr.bf16.mxu1 %v4612_v51  ;;  %v3400_v51 = vld [vmem:[%s903_s3] ss:$0 sm:$0xff] }
 0x6f2   : > { %3789 = vmatpush3.bf16.msra.mxu1 %v4107_v26 }
 0x6f3   : > { %2516 = vmatprep.subr.bf16.mxu1 %v4113_v11  ;;  %v4158_v11 = vld [vmem:[%s5143_s16] sm:$0xff]  }
 0x7a8   : > { %v3738_v56 = vpop.f32.mrb[4].mxu1 }
 0x7a9   : > { %4192 = vrcp.f32 %v3738_v56  ;;  %v1994_v55 = vpop.f32.mrb[5].mxu1 }
 0x7aa   : > { %4194 = vrcp.f32 %v1994_v55 }
 0x7b3   : > { %v4193_v12 = vpop.eup %4192 }
 0x7b4   : > { %v4195_v14 = vpop.eup %4194  ;;  %v2006_v7 = vmul.f32 %v4193_v12, %v4191_v18  ;;  %v4155_v18 = vld [vmem:[%s5141_s28 + $0xec] ss:$16 sps:$4 sm:$0xff]  }
 0x7b5   : > { %v2005_v2 = vmul.f32 %v4195_v14, %v4189_v4  ;;  %v4152_v4 = vld [vmem:[%s5141_s28 + $0xe4] ss:$16 sps:$4 sm:$0xff]  }
 0x7b7   : > { %3771 = vmatprep.mubr.f32.mxu0 %v2005_v2 }
 0x7b8   : > { %3772 = vmatmul.mubr.f32.vlgmr.msra.gmra.mrb[6].mxu0 %v2006_v7 }
 0x7b9   : > { %2505 = vmatprep.mubr.bf16.mxu0 %v4604_v22  ;;  %2474 = vmatpush1.bf16.msra.mxu0 %v4108_v10 }
 0x7ba   : > { %2475 = vmatprep.subr.bf16.mxu0 %v4116_v43  ;;  %v4161_v43 = vld [vmem:[%s5143_s16 + $0xc8] sm:$0xff]  }
 0x7bd   : > { %2476 = vmatpush1.bf16.msra.mxu0 %v4114_v13  ;;  %v4163_v13 = vld [vmem:[%s5143_s16 + $0x88] sm:$0xff]  }
 0x7be   : > { %2477 = vmatprep.subr.bf16.mxu0 %v4122_v37  ;;  %v4165_v37 = vld [vmem:[%s5143_s16 + $0xd0] sm:$0xff]  }
 0x7c1   : > { %2478 = vmatpush1.bf16.msra.mxu0 %v4120_v61  ;;  %v4167_v61 = vld [vmem:[%s5143_s16 + $0x90] sm:$0xff]  }
 0x7c2   : > { %2479 = vmatprep.subr.bf16.mxu0 %v4128_v21  ;;  %v4169_v21 = vld [vmem:[%s5143_s16 + $0xd8] sm:$0xff]  }
 0x7c5   : > { %2480 = vmatpush1.bf16.msra.mxu0 %v4126_v23  ;;  %v4171_v23 = vld [vmem:[%s5143_s16 + $0x98] sm:$0xff]  }
 0x7c6   : > { %2481 = vmatprep.subr.bf16.mxu0 %v4134_v58  ;;  %v4173_v58 = vld [vmem:[%s5143_s16 + $0xe0] sm:$0xff]  }
 0x7c9   : > { %2482 = vmatpush1.bf16.msra.mxu0 %v4132_v35  ;;  %v4174_v35 = vld [vmem:[%s5143_s16 + $0x20] sm:$0xff]  }
 0x7ca   : > { %2483 = vmatprep.subr.bf16.mxu0 %v4140_v40  ;;  %v4177_v40 = vld [vmem:[%s5143_s16 + $0xe8] sm:$0xff]  }
 0x7cd   : > { %2484 = vmatpush1.bf16.msra.mxu0 %v4138_v30  ;;  %v4179_v30 = vld [vmem:[%s5143_s16 + $0xa8] sm:$0xff]  }
 0x7ce   : > { %2485 = vmatprep.subr.bf16.mxu0 %v4146_v16  ;;  %v4181_v16 = vld [vmem:[%s5143_s16 + $0xf0] sm:$0xff]  }
 0x7d1   : > { %2486 = vmatpush1.bf16.msra.mxu0 %v4144_v29  ;;  %v4183_v29 = vld [vmem:[%s5143_s16 + $0xb0] sm:$0xff]  }
 0x7d2   : > { %2487 = vmatprep.subr.bf16.mxu0 %v4152_v4  ;;  %v4185_v4 = vld [vmem:[%s5143_s16 + $0xf8] sm:$0xff]  }
 0x7d5   : > { %2488 = vmatpush1.bf16.msra.mxu0 %v4150_v53  ;;  %v4187_v53 = vld [vmem:[%s5143_s16 + $0xb8] sm:$0xff]  }
 0x7d6   : > { %3576 = vmatprep.subr.bf16.mxu0 %v4156_v33  ;;  %v2307_v33 = vsub.s32 3, %v5167_v41 }
 0x88b   : > { %v3773_v39 = vpop.f32.mrb[6].mxu0 }
 0x88c   : > { %v2089_v3 = vpop.f32.mrb[7].mxu0 }
 0x88d   : > { %v2115_v59 = vpack.c.bf16 %v3773_v39, %v2089_v3 }
 0x88f   : > { %3791 = vmatmul.mubr.bf16.vlgmr.msra.gmra.mrb[8].mxu1 %v2115_v59 }
 0x890   : > { %2548 = vmatprep.mubr.bf16.mxu1 %v4604_v22  ;;  %2517 = vmatpush1.bf16.msra.mxu1 %v4111_v49  ;;  %v4160_v49 = vld [vmem:[%s5143_s16 + $0x48] sm:$0xff]  }
 0x891   : > { %2518 = vmatprep.subr.bf16.mxu1 %v4119_v20  ;;  %v4162_v20 = vld [vmem:[%s5143_s16 + $0x8] sm:$0xff]  }
 0x894   : > { %2519 = vmatpush1.bf16.msra.mxu1 %v4117_v54  ;;  %v4164_v54 = vld [vmem:[%s5143_s16 + $0x50] sm:$0xff]  }
 0x895   : > { %2520 = vmatprep.subr.bf16.mxu1 %v4125_v15  ;;  %v4166_v15 = vld [vmem:[%s5143_s16 + $0x10] sm:$0xff]  }
 0x898   : > { %2521 = vmatpush1.bf16.msra.mxu1 %v4123_v63  ;;  %v4168_v63 = vld [vmem:[%s5143_s16 + $0x58] sm:$0xff]  }
 0x899   : > { %2522 = vmatprep.subr.bf16.mxu1 %v4131_v24  ;;  %v4170_v24 = vld [vmem:[%s5143_s16 + $0x18] sm:$0xff]  }
 0x89c   : > { %2523 = vmatpush1.bf16.msra.mxu1 %v4129_v34  ;;  %v4172_v34 = vld [vmem:[%s5143_s16 + $0x60] sm:$0xff]  }
 0x89d   : > { %2524 = vmatprep.subr.bf16.mxu1 %v4137_v38  ;;  %v4176_v38 = vld [vmem:[%s5143_s16 + $0x68] sm:$0xff]  }
 0x8a0   : > { %2525 = vmatpush1.bf16.msra.mxu1 %v4135_v45  ;;  %v4175_v45 = vld [vmem:[%s5143_s16 + $0xa0] sm:$0xff]  }
 0x8a1   : > { %2526 = vmatprep.subr.bf16.mxu1 %v4143_v36  ;;  %v4178_v36 = vld [vmem:[%s5143_s16 + $0x28] sm:$0xff]  }
 0x8a4   : > { %2527 = vmatpush1.bf16.msra.mxu1 %v4141_v28  ;;  %v4180_v28 = vld [vmem:[%s5143_s16 + $0x70] sm:$0xff]  }
 0x8a5   : > { %2528 = vmatprep.subr.bf16.mxu1 %v4149_v5  ;;  %v4182_v5 = vld [vmem:[%s5143_s16 + $0x30] sm:$0xff]  }
 0x8a8   : > { %2529 = vmatpush1.bf16.msra.mxu1 %v4147_v32  ;;  %v4184_v32 = vld [vmem:[%s5143_s16 + $0x78] sm:$0xff]  }
 0x8a9   : > { %2530 = vmatprep.subr.bf16.mxu1 %v4155_v18  ;;  %v4186_v18 = vld [vmem:[%s5143_s16 + $0x38] sm:$0xff]  }
 0x8ac   : > { %2531 = vmatpush1.bf16.msra.mxu1 %v4153_v31  ;;  %v2290_v31 = vld [vmem:[%s5125_s4] sm:$0xf] }
 0x8ad   : > { %3598 = vmatprep.subr.bf16.mxu1 %v4157_v52  ;;  %v2296_v52 = vrot.slane %v2290_v31, %v1095_v42 }
 0x962   : > { %v2204_v25 = vpop.f32.mrb[8].mxu1 }
 0x963   : > { %v2205_v46 = vadd.f32 %v3400_v51, %v2204_v25  ;;  %v3792_v50 = vpop.f32.mrb[9].mxu1 }
 0x964   : > { %v2207_v60 = vpop.f32.mrb[10].mxu1  ;;  %v3409_v50 = vld [vmem:[%s6052_s14] ss:$0 sm:$0xff] }
 0x965   : > { %v5766_v57 = vadd.f32 %v4204_v0, %v2205_v46  ;;  %v2208_v9 = vadd.f32 %v3400_v51, %v2207_v60  ;;  %v3793_v19 = vpop.f32.mrb[11].mxu1 }
 0x967   : > { %v5768_v22 = vadd.f32 %v4205_v1, %v2208_v9  ;;  %2215 = vadd.xlane.f32.xlu0 %v5766_v57  ;;  %v2222_v6 = vmul.f32 %v5766_v57, %v5766_v57 }
 0x969   : > { %v2223_v62 = vmul.f32 %v5768_v22, %v5768_v22 }
 0x96b   : > { %2217 = vadd.xlane.f32.xlu0 %v5768_v22  ;;  %2226 = vadd.xlane.f32.xlu1 %v2223_v62 }
 0x96f   : > { %2224 = vadd.xlane.f32.xlu0 %v2222_v6 }
 0x9f4   : > { %v2216_v47 = vpop.xlane.xlu0 %2215 }
 0x9f5   : > { %v2220_v56 = vmul.f32 0.0078125, %v2216_v47  ;;  %v2304_v47 = vrot.slane %v2290_v31, %v1103_v27 }
 0x9f7   : > { %v2230_v7 = vmul.f32 %v2220_v56, %v2220_v56  ;;  %v2234_v60 = vsub.f32 %v5766_v57, %v2220_v56  ;;  %v4159_v57 = vld [vmem:[%s5143_s16 + $0x80] sm:$0xff]  }
 0x9f8   : > { %v2218_v48 = vpop.xlane.xlu0 %2217  ;;  %v2227_v17 = vpop.xlane.xlu1 %2226 }
 0x9f9   : > { %v2221_v55 = vmul.f32 0.0078125, %v2218_v48  ;;  %v2229_v14 = vmul.f32 0.0078125, %v2227_v17  ;;  %v2300_v48 = vrot.slane %v2290_v31, %v1099_v44  ;;  %v2308_v17 = vrot.slane %v2290_v31, %v2307_v33 }
 0x9fb   : > { %v2231_v12 = vmul.f32 %v2221_v55, %v2221_v55  ;;  %v2235_v25 = vsub.f32 %v5768_v22, %v2221_v55  ;;  %v3410_v22 = vld [vmem:[%s6054_s6] ss:$0 sm:$0xff] }
 0x9fc   : > { %v2225_v2 = vpop.xlane.xlu0 %2224 }
 0x9fd   : > { %v2233_v26 = vsub.f32 %v2229_v14, %v2231_v12  ;;  %v2228_v39 = vmul.f32 0.0078125, %v2225_v2 }
 0x9ff   : > { %v2237_v3 = vadd.f32 1e-05, %v2233_v26  ;;  %v2232_v59 = vsub.f32 %v2228_v39, %v2230_v7 }
 0xa01   : > { %4196 = vrsqrt.f32 %v2237_v3  ;;  %v2236_v51 = vadd.f32 1e-05, %v2232_v59 }
 0xa03   : > { %4198 = vrsqrt.f32 %v2236_v51 }
 0xa0b   : > { %v4197_v46 = vpop.eup %4196 }
 0xa0c   : > { %v2241_v0 = vmul.f32 %v4197_v46, %v2235_v25 }
 0xa0d   : > { %v4199_v9 = vpop.eup %4198 }
 0xa0e   : > { %v2240_v19 = vmul.f32 %v4199_v9, %v2234_v60  ;;  %v2249_v1 = vmul.f32 %v3409_v50, %v2241_v0 }
 0xa10   : > { %v2248_v62 = vmul.f32 %v3409_v50, %v2240_v19  ;;  %v5824_v8 = vadd.f32 %v3410_v22, %v2249_v1 }
 0xa12   : > { %v5822_v6 = vadd.f32 %v3410_v22, %v2248_v62 }
 0xa14   : > { %v2291_v10 = vpack.c.bf16 %v5824_v8, %v5822_v6 }
 0xa16   : > { %2506 = vmatmul.mubr.bf16.vlgmr.msra.gmra.mrb[8].mxu0 %v2291_v10  ;;  %2549 = vmatmul.mubr.bf16.vlgmr.msra.gmra.mrb[12].mxu1 %v2291_v10 }
 0xa17   : > { %3577 = vmatpush3.bf16.msra.mxu0 %v4158_v11  ;;  %3599 = vmatpush3.bf16.msra.mxu1 %v4159_v57 }
 0xa18   : > { %3578 = vmatprep.subr.bf16.mxu0 %v4160_v49  ;;  %3600 = vmatprep.subr.bf16.mxu1 %v4161_v43 }
 0xa1b   : > { %3579 = vmatpush3.bf16.msra.mxu0 %v4162_v20  ;;  %3601 = vmatpush3.bf16.msra.mxu1 %v4163_v13  ;;  %v3443_v20 = vld [vmem:[%s916_s29] ss:$0 sm:$0xff] }
 0xa1c   : > { %3580 = vmatprep.subr.bf16.mxu0 %v4164_v54  ;;  %3602 = vmatprep.subr.bf16.mxu1 %v4165_v37 }
 0xa1f   : > { %3581 = vmatpush3.bf16.msra.mxu0 %v4166_v15  ;;  %3603 = vmatpush3.bf16.msra.mxu1 %v4167_v61 }
 0xa20   : > { %3582 = vmatprep.subr.bf16.mxu0 %v4168_v63  ;;  %3604 = vmatprep.subr.bf16.mxu1 %v4169_v21 }
 0xa23   : > { %3583 = vmatpush3.bf16.msra.mxu0 %v4170_v24  ;;  %3605 = vmatpush3.bf16.msra.mxu1 %v4171_v23 }
 0xa24   : > { %3584 = vmatprep.subr.bf16.mxu0 %v4172_v34  ;;  %3606 = vmatprep.subr.bf16.mxu1 %v4173_v58 }
 0xa27   : > { %3585 = vmatpush3.bf16.msra.mxu0 %v4174_v35  ;;  %3607 = vmatpush3.bf16.msra.mxu1 %v4175_v45 }
 0xa28   : > { %3586 = vmatprep.subr.bf16.mxu0 %v4176_v38  ;;  %3608 = vmatprep.subr.bf16.mxu1 %v4177_v40 }
 0xa2b   : > { %3587 = vmatpush3.bf16.msra.mxu0 %v4178_v36  ;;  %3609 = vmatpush3.bf16.msra.mxu1 %v4179_v30 }
 0xa2c   : > { %3588 = vmatprep.subr.bf16.mxu0 %v4180_v28  ;;  %3610 = vmatprep.subr.bf16.mxu1 %v4181_v16 }
 0xa2f   : > { %3589 = vmatpush3.bf16.msra.mxu0 %v4182_v5  ;;  %3611 = vmatpush3.bf16.msra.mxu1 %v4183_v29 }
 0xa30   : > { %3590 = vmatprep.subr.bf16.mxu0 %v4184_v32  ;;  %3612 = vmatprep.subr.bf16.mxu1 %v4185_v4 }
 0xa33   : > { %3591 = vmatpush3.bf16.msra.mxu0 %v4186_v18  ;;  %3613 = vmatpush3.bf16.msra.mxu1 %v4187_v53 }
 0xae9   : > { %v2507_v56 = vpop.f32.mrb[8].mxu0  ;;  %v2550_v55 = vpop.f32.mrb[12].mxu1 }
 0xaea   : > { %v2508_v12 = vadd.f32 %v2507_v56, %v2296_v52  ;;  %v2551_v14 = vadd.f32 %v2550_v55, %v2304_v47  ;;  %v2509_v2 = vpop.f32.mrb[9].mxu0  ;;  %v2552_v7 = vpop.f32.mrb[13].mxu1  ;;  %v3476_v55 = vld [vmem:[%s919_s8] ss:$0 sm:$0xff] }
 0xaeb   : > { %v2510_v26 = vadd.f32 %v2509_v2, %v2300_v48  ;;  %v2553_v39 = vadd.f32 %v2552_v7, %v2308_v17  ;;  %v2511_v3 = vpop.f32.mrb[10].mxu0  ;;  %v2554_v59 = vpop.f32.mrb[14].mxu1  ;;  %v3477_v7 = vld [vmem:[%s922_s12] ss:$0 sm:$0xff]  ;;  %s6058_s12 = sld [smem:[#allocation34_spill]] (!%p3478_p6) }
 0xaec   : > { %v2512_v51 = vadd.f32 %v2511_v3, %v2296_v52  ;;  %v2555_v25 = vadd.f32 %v2554_v59, %v2304_v47  ;;  %v2513_v42 = vpop.f32.mrb[11].mxu0  ;;  %v2556_v46 = vpop.f32.mrb[15].mxu1  ;;  %v2559_v60 = vmax.f32 %v2508_v12, 0.0  ;;  %v2561_v41 = vmax.f32 %v2551_v14, 0.0 }
 0xaed   : > { %v2514_v50 = vadd.f32 %v2513_v42, %v2300_v48  ;;  %v2557_v27 = vadd.f32 %v2556_v46, %v2308_v17  ;;  %v2560_v9 = vmax.f32 %v2510_v26, 0.0  ;;  %v2562_v19 = vmax.f32 %v2553_v39, 0.0  ;;  %v4207_v46 = vld [vmem:[#allocation12 + $0x8] sm:$0xff] (!%p3478_p6)  }
 0xaee   : > { %v2563_v44 = vmax.f32 %v2512_v51, 0.0  ;;  %v2565_v0 = vmax.f32 %v2555_v25, 0.0  ;;  %v4206_v25 = vld [vmem:[#allocation12] sm:$0xff] (!%p3478_p6)   ;;  %v4614_v42 = vmov (!%p3478_p6), 0.0  }
 0xaef   : > { %v2564_v1 = vmax.f32 %v2514_v50, 0.0  ;;  %v2566_v22 = vmax.f32 %v2557_v27, 0.0  ;;  %3794 = vmatprep.subr.bf16.mxu0 (!%p3478_p6), %v4614_v42  ;;  %v4208_v50 = vld [vmem:[#allocation12 + $0x10] sm:$0xff] (!%p3478_p6)   ;;  %v4209_v27 = vld [vmem:[#allocation12 + $0x18] sm:$0xff] (!%p3478_p6)  }
 0xaf0   : > { %v2632_v62 = vpack.c.bf16 %v2563_v44, %v2559_v60  ;;  %v2634_v11 = vpack.c.bf16 %v2565_v0, %v2561_v41  ;;  %v4210_v60 = vld [vmem:[#allocation12 + $0x20] sm:$0xff] (!%p3478_p6)   ;;  %v4211_v41 = vld [vmem:[#allocation12 + $0x28] sm:$0xff] (!%p3478_p6)   ;;  %v4212_v44 = vld [vmem:[#allocation12 + $0x30] sm:$0xff] (!%p3478_p6)  }
 0xaf1   : > { %v2633_v57 = vpack.c.bf16 %v2564_v1, %v2560_v9  ;;  %v2635_v10 = vpack.c.bf16 %v2566_v22, %v2562_v19  ;;  %v4213_v0 = vld [vmem:[#allocation12 + $0x38] sm:$0xff] (!%p3478_p6)   ;;  %v3479_v19 = vld [vmem:[%s6058_s12] ss:$0 sm:$0xff] (!%p3478_p6) }
 0xaf3   : > { %2866 = vmatprep.mubr.bf16.mxu0 %v2633_v57  ;;  %2907 = vmatprep.mubr.bf16.mxu1 %v2635_v10 }
 0xaf4   : > { %2867 = vmatmul.mubr.bf16.vlgmr.msra.gmra.mrb[12].mxu0 %v2632_v62  ;;  %2908 = vmatmul.mubr.bf16.vlgmr.msra.gmra.mrb[16].mxu1 %v2634_v11 }
 0xaf5   : > { %3795 = vmatpush3.bf16.msra.mxu0 (!%p3478_p6), %v4206_v25  ;;  %3810 = vmatprep.mubr.msk.bf16.mxu0 (!%p3478_p6), %vm4615_vm9, %v4614_v42 }
 0xaf6   : > { %3796 = vmatprep.subr.bf16.mxu0 (!%p3478_p6), %v4614_v42 }
 0xaf9   : > { %3797 = vmatpush3.bf16.msra.mxu0 (!%p3478_p6), %v4207_v46 }
 0xafa   : > { %3798 = vmatprep.subr.bf16.mxu0 (!%p3478_p6), %v4614_v42 }
 0xafd   : > { %3799 = vmatpush3.bf16.msra.mxu0 (!%p3478_p6), %v4208_v50 }
 0xafe   : > { %3800 = vmatprep.subr.bf16.mxu0 (!%p3478_p6), %v4614_v42 }
 0xb01   : > { %3801 = vmatpush3.bf16.msra.mxu0 (!%p3478_p6), %v4209_v27 }
 0xb02   : > { %3802 = vmatprep.subr.bf16.mxu0 (!%p3478_p6), %v4614_v42 }
 0xb05   : > { %3803 = vmatpush3.bf16.msra.mxu0 (!%p3478_p6), %v4210_v60 }
 0xb06   : > { %3804 = vmatprep.subr.bf16.mxu0 (!%p3478_p6), %v4614_v42 }
 0xb09   : > { %3805 = vmatpush3.bf16.msra.mxu0 (!%p3478_p6), %v4211_v41 }
 0xb0a   : > { %3806 = vmatprep.subr.bf16.mxu0 (!%p3478_p6), %v4614_v42 }
 0xb0d   : > { %3807 = vmatpush3.bf16.msra.mxu0 (!%p3478_p6), %v4212_v44 }
 0xb0e   : > { %3808 = vmatprep.subr.bf16.mxu0 (!%p3478_p6), %v4614_v42 }
 0xb11   : > { %3809 = vmatpush3.bf16.msra.mxu0 (!%p3478_p6), %v4213_v0 }
 0xbc7   : > { %v3592_v49 = vpop.f32.mrb[12].mxu0  ;;  %v3614_v43 = vpop.f32.mrb[16].mxu1 }
 0xbc8   : > { %v3593_v13 = vpop.f32.mrb[13].mxu0  ;;  %v3615_v54 = vpop.f32.mrb[17].mxu1 }
 0xbc9   : > { %v3594_v37 = vadd.f32 %v3593_v13, %v3592_v49  ;;  %v3616_v15 = vadd.f32 %v3615_v54, %v3614_v43  ;;  %v3595_v61 = vpop.f32.mrb[14].mxu0  ;;  %v3617_v63 = vpop.f32.mrb[18].mxu1 }
 0xbca   : > { %v3596_v21 = vpop.f32.mrb[15].mxu0  ;;  %v3618_v24 = vpop.f32.mrb[19].mxu1 }
 0xbcb   : > { %v2869_v23 = vadd.f32 %v3594_v37, %v3443_v20  ;;  %v3597_v34 = vadd.f32 %v3596_v21, %v3595_v61  ;;  %v3619_v58 = vadd.f32 %v3618_v24, %v3617_v63 }
 0xbcd   : > { %v2910_v35 = vadd.f32 %v3616_v15, %v2869_v23  ;;  %v2872_v45 = vadd.f32 %v3597_v34, %v3443_v20 }
 0xbcf   : > { %v2913_v38 = vadd.f32 %v3619_v58, %v2872_v45  ;;  %v2916_v40 = vadd.f32 %v2910_v35, %v5822_v6 }
 0xbd1   : > { %2920 = vadd.xlane.f32.xlu0 %v2916_v40  ;;  %v2917_v36 = vadd.f32 %v2913_v38, %v5824_v8  ;;  %v2926_v30 = vmul.f32 %v2916_v40, %v2916_v40 }
 0xbd3   : > { %2922 = vadd.xlane.f32.xlu1 %v2917_v36  ;;  %v2927_v28 = vmul.f32 %v2917_v36, %v2917_v36 }
 0xbd5   : > { %2928 = vadd.xlane.f32.xlu0 %v2926_v30 }
 0xbd7   : > { %2930 = vadd.xlane.f32.xlu1 %v2927_v28 }
 0xc5e   : > { %v2921_v16 = vpop.xlane.xlu0 %2920 }
 0xc5f   : > { %v2924_v5 = vmul.f32 0.0078125, %v2921_v16 }
 0xc60   : > { %v2923_v29 = vpop.xlane.xlu1 %2922 }
 0xc61   : > { %v2925_v32 = vmul.f32 0.0078125, %v2923_v29  ;;  %v2934_v18 = vmul.f32 %v2924_v5, %v2924_v5  ;;  %v2938_v17 = vsub.f32 %v2916_v40, %v2924_v5 }
 0xc62   : > { %v2929_v4 = vpop.xlane.xlu0 %2928 }
 0xc63   : > { %v2932_v53 = vmul.f32 0.0078125, %v2929_v4  ;;  %v2935_v33 = vmul.f32 %v2925_v32, %v2925_v32  ;;  %v2939_v12 = vsub.f32 %v2917_v36, %v2925_v32 }
 0xc64   : > { %v2931_v31 = vpop.xlane.xlu1 %2930 }
 0xc65   : > { %v2936_v6 = vsub.f32 %v2932_v53, %v2934_v18  ;;  %v2933_v52 = vmul.f32 0.0078125, %v2931_v31 }
 0xc67   : > { %v2940_v47 = vadd.f32 1e-05, %v2936_v6  ;;  %v2937_v8 = vsub.f32 %v2933_v52, %v2935_v33 }
 0xc69   : > { %4200 = vrsqrt.f32 %v2940_v47  ;;  %v2941_v48 = vadd.f32 1e-05, %v2937_v8 }
 0xc6b   : > { %4202 = vrsqrt.f32 %v2941_v48 }
 0xc73   : > { %v4201_v56 = vpop.eup %4200 }
 0xc74   : > { %v2944_v14 = vmul.f32 %v4201_v56, %v2938_v17 }
 0xc75   : > { %v4203_v2 = vpop.eup %4202 }
 0xc76   : > { %v2952_v26 = vmul.f32 %v3476_v55, %v2944_v14  ;;  %v2945_v39 = vmul.f32 %v4203_v2, %v2939_v12  ;;  %2967 = sbr.rel (%p3478_p6) target bundleno = 3415 (0xd57), region = 144 }
 0xc78   : > { %v2960_v3 = vadd.f32 %v3477_v7, %v2952_v26  ;;  %v2953_v59 = vmul.f32 %v3476_v55, %v2945_v39 }
 0xc7a   : > { %2962 = vst [vmem:[#allocation2] sm:$0xff] %v2960_v3  ;;  %v2961_v51 = vadd.f32 %v3477_v7, %v2953_v59 }
 0xc7c   : > { %2963 = vst [vmem:[#allocation2 + $0x8] sm:$0xff] %v2961_v51  ;;  %v2968_v9 = vpack.c.bf16 (!%p3478_p6), %v2961_v51, %v2960_v3 }
 0xc7e   : > { %3811 = vmatmul.mubr.bf16.vlgmr.msra.gmra.mrb[0].mxu0 %v2968_v9 }
 0xd51   : > { %v3074_v1 = vpop.f32.mrb[0].mxu0 }
 0xd52   : > { %v3075_v22 = vadd.f32 %v3479_v19, %v3074_v1  ;;  %v3812_v62 = vpop.f32.mrb[1].mxu0 }
 0xd53   : > { %v3077_v11 = vpop.f32.mrb[2].mxu0 }
 0xd54   : > { %3081 = vst [vmem:[#allocation18] sm:$0xff] %v3075_v22  ;;  %v3078_v57 = vadd.f32 %v3479_v19, %v3077_v11  ;;  %v3813_v10 = vpop.f32.mrb[3].mxu0 }
 0xd56   : > { %3082 = vst [vmem:[#allocation18 + $0x8] sm:$0xff] %v3078_v57 }
 0xd57 PF: > { %p3995_p4 = scmp.eq.s32.totalorder %s4740_s2, 3  ;;  %s4616_s20 = smov [#allocation18]  }
 0xd58   : > { %s3089_s23 = sshll.u32 %s4616_s20, 4  ;;  %s3090_s23 = int_to_ptr.vmem [resolvable:$true] %s3089_s23 }
 0xd59   : > { %s4502_s27 = scalar_lea.vmem %s3090_s23, 256  ;;  %p4509_p7 = scmp.lt.s32.totalorder %s3090_s23, %s3090_s23 }
 0xd5a   : > { %p4503_p12 = scmp.ne.s32.totalorder %s3090_s23, %s4502_s27  ;;  %p4510_p2 = scmp.lt.s32.totalorder %s4502_s27, %s4502_s27 }
 0xd5c   : > { %p4504_p8 = pnand %p4503_p12, %p3995_p4  ;;  %p4511_p11 = por %p4510_p2, %p4509_p7 }
 0xd5e   : > { %p4505_p1 = pneg %p4504_p8 }
 0xd60   : > { %p4512_p10 = pnand %p4511_p11, %p4505_p1 }
 0xd62   : > { %4515 = shalt.err (!%p4512_p10)
}
 0xd63   : > { %s6059_s26 = sld [smem:[#allocation46_spill]] }
 0xd69   : > { %s4516_s3 = scalar_lea.hbm %s6059_s26, 256 }
 0xd6a   : > { %p4517_p0 = scmp.ne.s32.totalorder %s6059_s26, %s4516_s3  ;;  %p4522_p9 = scmp.lt.u32.totalorder %s4516_s3, %s6059_s26 }
 0xd6c   : > { %p4518_p5 = pnand %p4517_p0, %p3995_p4 }
 0xd6e   : > { %p4519_p3 = pneg %p4518_p5 }
 0xd70   : > { %p4524_p13 = pnand %p4522_p9, %p4519_p3 }
 0xd72   : > { %4527 = shalt.err (!%p4524_p13)
}
 0xd73   : > { %s4617_s24 = smov 128   ;;  %s4618_s17 = smov 8  }
 0xd74   : > { %3947 = dma.vmem_to_hbm [thread:$0]  (%p3995_p4), %s3090_s23, 256, %s6059_s26, [#allocation5], %s4617_s24, %s4617_s24, %s4618_s17  }
 0xd75   : > { %4565 = dma.done.wait (%p3995_p4), [#allocation5], 256  }
 0xd76   : > { %4567 = vsyncadd (%p3995_p4), [#allocation5], 4294967040 }
 0xd77 PF: > { %s6060_s21 = sld [smem:[#allocation26_spill]]  ;;  %s6061_s7 = sld [smem:[#allocation25_spill]] }
 0xd78   : > { %s6062_s20 = sld [smem:[#allocation27_spill]]  ;;  %s6063_s0 = smov %s4574_s30 }
 0xd7d   : > { %p31_p6 = scmp.ge.s32.totalorder %s6060_s21, 6   ;;  %s6064_s30 = smov %s6061_s7 }
 0xd7f   :  { %33 = sbr.rel (!%p31_p6) target bundleno = 25 (0x19), region = 221 }
 0xd86   :  { %3105 = vsyncpa [#allocation4], 1 }
 0xd87   :  { %3107 = vsyncpa [#allocation4 + $0x1], 1 }
 0xd88   :  { %3108 = vsyncpa [#allocation7], 1 }
 0xd89   :  { %3109 = vsyncpa [#allocation10], 1 }
 0xd8a   :  { %3110 = vsyncpa [#allocation13], 1 }
 0xd8b   :  { %3111 = vsyncpa [#allocation5], 1 }
 0xd8c   :  { %3113 = vsyncpa [#allocation5 + $0x1], 1 }

</bundles_post_ra>
